<compile_context>
chip_gen: v7x
topology: tpu7x:2x2x1
jax: 0.10.0
libtpu: 0.0.40
codegen_flags: <defaults>
</compile_context>

<pallas_src>
import functools
import math

import jax
import jax.numpy as jnp
from jax.experimental import pallas as pl
from jax.experimental.pallas import tpu as pltpu


# ----------------------------------------------------------------------------
# Pallas kernel: fused bidirectional LSTM recurrence for one layer.
# Grid = (Tp // tb,) time blocks (strictly sequential -> "arbitrary").
#   gxf_ref : (tb, Bp, 4H)  hoisted gates, forward stream, block g
#   gxr_ref : (tb, Bp, 4H)  hoisted gates, reverse stream, block nb-1-g
#   b_ref   : (2, 4H)       fused biases (f32), fwd / rev
#   whh_hbm : (2, H, 4H)    recurrent weights, left in HBM (pl.ANY)
#   outf/outr_ref : (tb, Bp, H) hidden states per direction
#   whh_vmem, h*/c* : VMEM scratch carried across grid steps
# NOTE: the g==0 init relies on the grid iterating 0..nb-1 in order (true for
# a sequential "arbitrary" axis today).
# ----------------------------------------------------------------------------
def _bilstm_kernel(gxf_ref, gxr_ref, b_ref, whh_hbm_ref,
                   outf_ref, outr_ref,
                   whh_vmem, hf_ref, cf_ref, hr_ref, cr_ref,
                   *, tb, hidden, t_valid, mask_tail):
    gidx = pl.program_id(0)
    nblk = pl.num_programs(0)
    H = hidden
    Bp, G4 = gxf_ref.shape[1], gxf_ref.shape[2]

    @pl.when(gidx == 0)
    def _():
        # Recurrent weights copied HBM->VMEM exactly once per layer call
        # (single copy in scratch; no pipeline double-buffer for weights).
        pltpu.sync_copy(whh_hbm_ref, whh_vmem)
        hf_ref[...] = jnp.zeros_like(hf_ref)
        cf_ref[...] = jnp.zeros_like(cf_ref)
        hr_ref[...] = jnp.zeros_like(hr_ref)
        cr_ref[...] = jnp.zeros_like(cr_ref)

    w_f = whh_vmem[0]                       # (H, 4H), resident in VMEM
    w_r = whh_vmem[1]
    cdt = whh_vmem.dtype
    # Hoist the bias broadcasts out of the step loop (f32 adds).
    bias_f = jnp.broadcast_to(b_ref[0:1, :], (Bp, G4))
    bias_r = jnp.broadcast_to(b_ref[1:2, :], (Bp, G4))

    h_f = hf_ref[...]
    c_f = cf_ref[...]
    h_r = hr_ref[...]
    c_r = cr_ref[...]

    def lstm_cell(gates, c_prev):
        # i/f/o columns were pre-scaled by 0.5 at param-prep time, so a single
        # vector-wide tanh yields all four gates (sigmoid(x)=0.5*tanh(x/2)+0.5).
        # NOTE: for production, H should be a multiple of 128 so these gate
        # slices are lane-aligned.
        t = jnp.tanh(gates)
        ig = 0.5 * t[:, 0 * H:1 * H] + 0.5
        fg = 0.5 * t[:, 1 * H:2 * H] + 0.5
        gg = t[:, 2 * H:3 * H]
        og = 0.5 * t[:, 3 * H:4 * H] + 0.5
        c_new = fg * c_prev + ig * gg
        h_new = og * jnp.tanh(c_new)
        return h_new, c_new

    # Fully-unrolled static inner time loop: every ref index below is a Python
    # int, so all loads/stores are static aligned slices (no dynamic address
    # math, no per-step selects for direction handling).
    for s in range(tb):
        # ---- forward chain: time block gidx, local step s -------------------
        gates_f = (gxf_ref[s].astype(jnp.float32) + bias_f +
                   jnp.dot(h_f.astype(cdt), w_f,
                           preferred_element_type=jnp.float32))
        h_f, c_f = lstm_cell(gates_f, c_f)
        outf_ref[s] = h_f

        # ---- reverse chain: time block nblk-1-gidx, local step tb-1-s ------
        sr = tb - 1 - s
        gates_r = (gxr_ref[sr].astype(jnp.float32) + bias_r +
                   jnp.dot(h_r.astype(cdt), w_r,
                           preferred_element_type=jnp.float32))
        h_new, c_new = lstm_cell(gates_r, c_r)
        if mask_tail:
            # Zero padding lives at the END of the original time axis; the
            # reverse chain hits it first, so freeze its state there.
            t_rev = (nblk - 1 - gidx) * tb + sr
            valid = t_rev < t_valid
            h_r = jnp.where(valid, h_new, h_r)
            c_r = jnp.where(valid, c_new, c_r)
        else:
            h_r, c_r = h_new, c_new
        outr_ref[sr] = h_r

    hf_ref[...] = h_f
    cf_ref[...] = c_f
    hr_ref[...] = h_r
    cr_ref[...] = c_r


def _bilstm_recurrence(gx_f, gx_r, b, whh, *, tb, t_valid):
    """gx_f/gx_r: (Tp, Bp, 4H), b: (2, 4H) f32, whh: (2, H, 4H).

    Returns (out_fwd, out_rev), each (Tp, Bp, H) float32, in original time order.
    """
    Tp, Bp, G4 = gx_f.shape
    H = whh.shape[1]
    nb = Tp // tb
    csz = jnp.dtype(gx_f.dtype).itemsize
    wsz = jnp.dtype(whh.dtype).itemsize

    kernel = functools.partial(_bilstm_kernel, tb=tb, hidden=H,
                               t_valid=t_valid, mask_tail=(Tp > t_valid))

    # VMEM working set: double-buffered gx/out blocks + single weight copy +
    # recurrent state + bias.  Limit sized to fit v7x's 64 MiB physical VMEM.
    need = (2 * 2 * tb * Bp * G4 * csz      # gx_f + gx_r blocks, double buffered
            + 2 * 2 * tb * Bp * H * 4       # out_f + out_r blocks, double buffered
            + 2 * H * G4 * wsz              # whh, single resident copy
            + 4 * Bp * H * 4                # h/c state (both directions)
            + 2 * 2 * G4 * 4)               # bias
    vmem_limit = int(min(max(2 * need, 32 * 2 ** 20), 56 * 2 ** 20))

    return pl.pallas_call(
        kernel,
        out_shape=(jax.ShapeDtypeStruct((Tp, Bp, H), jnp.float32),
                   jax.ShapeDtypeStruct((Tp, Bp, H), jnp.float32)),
        grid_spec=pltpu.PrefetchScalarGridSpec(
            num_scalar_prefetch=0,
            grid=(nb,),
            in_specs=[
                pl.BlockSpec((tb, Bp, G4), lambda g: (g, 0, 0)),            # fwd gx
                pl.BlockSpec((tb, Bp, G4), lambda g: (nb - 1 - g, 0, 0)),   # rev gx
                pl.BlockSpec((2, G4), lambda g: (0, 0)),                    # bias
                pl.BlockSpec(memory_space=pl.ANY),                          # whh (HBM)
            ],
            out_specs=[
                pl.BlockSpec((tb, Bp, H), lambda g: (g, 0, 0)),             # fwd out
                pl.BlockSpec((tb, Bp, H), lambda g: (nb - 1 - g, 0, 0)),    # rev out
            ],
            scratch_shapes=[
                pltpu.VMEM((2, H, G4), whh.dtype),   # resident recurrent weights
                pltpu.VMEM((Bp, H), jnp.float32),    # h forward
                pltpu.VMEM((Bp, H), jnp.float32),    # c forward
                pltpu.VMEM((Bp, H), jnp.float32),    # h reverse
                pltpu.VMEM((Bp, H), jnp.float32),    # c reverse
            ],
        ),
        compiler_params=pltpu.CompilerParams(
            # One sequential time axis; both directions are interleaved inside
            # the body (single-TC v5e/v6e gain nothing from a parallel
            # direction axis, and interleaving hides per-step MXU/EUP latency).
            dimension_semantics=("arbitrary",),
            vmem_limit_bytes=vmem_limit),
    )(gx_f, gx_r, b, whh)


# ----------------------------------------------------------------------------
# Parameter init (PyTorch nn.LSTM layout) and one-time prep for the kernel.
# ----------------------------------------------------------------------------
def init_encoder_params(key, input_size, hidden_size, num_layers):
    """Deterministic PyTorch-shaped nn.LSTM parameters (uniform(-1/sqrt(H), +))."""
    params = []
    bound = 1.0 / math.sqrt(hidden_size)
    for layer in range(num_layers):
        in_dim = input_size if layer == 0 else 2 * hidden_size
        dirs = []
        for _ in range(2):  # forward, reverse
            key, k1, k2, k3, k4 = jax.random.split(key, 5)
            w_ih = jax.random.uniform(k1, (4 * hidden_size, in_dim),
                                      jnp.float32, -bound, bound)
            w_hh = jax.random.uniform(k2, (4 * hidden_size, hidden_size),
                                      jnp.float32, -bound, bound)
            b_ih = jax.random.uniform(k3, (4 * hidden_size,),
                                      jnp.float32, -bound, bound)
            b_hh = jax.random.uniform(k4, (4 * hidden_size,),
                                      jnp.float32, -bound, bound)
            dirs.append((w_ih, w_hh, b_ih, b_hh))
        params.append(dirs)
    return params


def prepare_encoder_params(params, compute_dtype=jnp.bfloat16):
    """Transpose, fuse biases, stack directions, pre-scale i/f/o gates by 0.5.

    Done once, outside the hot path.  Returns per-layer tuples
    (W_ih (2, in, 4H) compute_dtype, W_hh (2, H, 4H) compute_dtype, b (2, 4H) f32).
    The 0.5 pre-scale lets the kernel evaluate all gates with one tanh.
    """
    prepped = []
    for layer in params:
        wih_list, whh_list, b_list = [], [], []
        for (w_ih, w_hh, b_ih, b_hh) in layer:
            h4 = w_ih.shape[0]
            h = h4 // 4
            ps = jnp.concatenate([
                jnp.full((h,), 0.5, jnp.float32),
                jnp.full((h,), 0.5, jnp.float32),
                jnp.ones((h,), jnp.float32),
                jnp.full((h,), 0.5, jnp.float32),
            ])
            wih_list.append((w_ih * ps[:, None]).T.astype(compute_dtype))  # (in, 4H)
            whh_list.append((w_hh * ps[:, None]).T.astype(compute_dtype))  # (H, 4H)
            b_list.append(((b_ih + b_hh) * ps).astype(jnp.float32))        # (4H,)
        prepped.append((jnp.stack(wih_list), jnp.stack(whh_list), jnp.stack(b_list)))
    return prepped


def _choose_time_block(T, Bp, H, cdtype_bytes, *, max_tb=32,
                       budget_bytes=40 * 2 ** 20):
    """Largest time block whose pipelined VMEM working set fits the budget."""
    per_t = 2 * 2 * Bp * 4 * H * cdtype_bytes + 2 * 2 * Bp * H * 4
    fixed = 2 * H * 4 * H * cdtype_bytes + 4 * Bp * H * 4
    fit = (budget_bytes - fixed) // max(per_t, 1)
    return int(max(1, min(T, max_tb, fit)))


# ----------------------------------------------------------------------------
# Encoder forward: multi-layer bidirectional LSTM (batch_first output).
# ----------------------------------------------------------------------------
def encoder_forward(inputs_btd, prepped_params, *, max_time_block=32):
    """inputs_btd: (B, T, input_size) -> (B, T, 2*hidden_size) float32."""
    B, T, _ = inputs_btd.shape
    wih0, whh0, _ = prepped_params[0]
    H = whh0.shape[1]
    cdtype = wih0.dtype
    csz = jnp.dtype(cdtype).itemsize

    # Pad batch to the compute dtype's sublane tile (bf16 packs 16 rows).
    sub = 16 if csz == 2 else 8
    Bp = -(-B // sub) * sub
    tb = _choose_time_block(T, Bp, H, csz, max_tb=max_time_block)
    Tp = -(-T // tb) * tb

    # Time-major once; pad batch & time once (zero pad at the END of time; the
    # kernel freezes the reverse chain over the padded tail).
    x = jnp.transpose(inputs_btd, (1, 0, 2)).astype(jnp.float32)   # (T, B, D)
    x = jnp.pad(x, ((0, Tp - T), (0, Bp - B), (0, 0)))             # (Tp, Bp, D)

    out_f = out_r = None
    for li, (wih_s, whh_s, b_s) in enumerate(prepped_params):
        # Hoisted input projection for both directions: big MXU matmuls done
        # by XLA outside the recurrence; gx is stored in the compute dtype
        # (bf16 by default) since it is the dominant HBM stream.
        if li == 0:
            xc = x.astype(cdtype)
            gx_f = jnp.einsum('tbi,ig->tbg', xc, wih_s[0],
                              preferred_element_type=jnp.float32).astype(cdtype)
            gx_r = jnp.einsum('tbi,ig->tbg', xc, wih_s[1],
                              preferred_element_type=jnp.float32).astype(cdtype)
        else:
            # Split W_ih over the fwd/rev feature halves so the (Tp, Bp, 2H)
            # concatenation of the previous layer's outputs is never built.
            o_f = out_f.astype(cdtype)
            o_r = out_r.astype(cdtype)
            gx_f = (jnp.einsum('tbi,ig->tbg', o_f, wih_s[0, :H],
                               preferred_element_type=jnp.float32) +
                    jnp.einsum('tbi,ig->tbg', o_r, wih_s[0, H:],
                               preferred_element_type=jnp.float32)).astype(cdtype)
            gx_r = (jnp.einsum('tbi,ig->tbg', o_f, wih_s[1, :H],
                               preferred_element_type=jnp.float32) +
                    jnp.einsum('tbi,ig->tbg', o_r, wih_s[1, H:],
                               preferred_element_type=jnp.float32)).astype(cdtype)

        out_f, out_r = _bilstm_recurrence(gx_f, gx_r, b_s, whh_s,
                                          tb=tb, t_valid=T)
        # TODO(synk): training-mode inter-layer dropout (dropout_prob) skipped.

    y = jnp.concatenate([out_f[:T, :B], out_r[:T, :B]], axis=-1)   # (T, B, 2H)
    return jnp.transpose(y, (1, 0, 2))                             # (B, T, 2H)


# ----------------------------------------------------------------------------
# Pure-JAX reference (lax.scan) for correctness checks (raw PyTorch params).
# ----------------------------------------------------------------------------
def _ref_direction(x_tbd, w_ih, w_hh, b_ih, b_hh, reverse):
    T, B, _ = x_tbd.shape
    H = w_hh.shape[1]
    xs = x_tbd[::-1] if reverse else x_tbd

    def step(carry, x_t):
        h, c = carry
        gates = x_t @ w_ih.T + h @ w_hh.T + b_ih + b_hh
        i = jax.nn.sigmoid(gates[:, :H])
        f = jax.nn.sigmoid(gates[:, H:2 * H])
        g = jnp.tanh(gates[:, 2 * H:3 * H])
        o = jax.nn.sigmoid(gates[:, 3 * H:])
        c = f * c + i * g
        h = o * jnp.tanh(c)
        return (h, c), h

    init = (jnp.zeros((B, H), jnp.float32), jnp.zeros((B, H), jnp.float32))
    _, hs = jax.lax.scan(step, init, xs)
    return hs[::-1] if reverse else hs


def _ref_encoder(inputs_btd, params):
    x = jnp.transpose(inputs_btd, (1, 0, 2)).astype(jnp.float32)
    for layer_params in params:
        outs = [_ref_direction(x, *p, reverse=(d == 1))
                for d, p in enumerate(layer_params)]
        x = jnp.concatenate(outs, axis=-1)
    return jnp.transpose(x, (1, 0, 2))


if __name__ == "__main__":
    input_size, hidden_size, num_layers, dropout_prob = 16, 32, 2, 0.0

    key = jax.random.PRNGKey(0)
    key, pkey = jax.random.split(key)
    params = init_encoder_params(pkey, input_size, hidden_size, num_layers)

    # Case A: f32 compute path, T divisible by the time block (tight check).
    key, k1 = jax.random.split(key)
    x_a = jax.random.normal(k1, (2, 8, input_size), jnp.float32)
    prepped_f32 = prepare_encoder_params(params, compute_dtype=jnp.float32)
    out_a = jax.block_until_ready(encoder_forward(x_a, prepped_f32))
    assert out_a.shape == (2, 8, 2 * hidden_size), out_a.shape
    ref_a = jax.block_until_ready(_ref_encoder(x_a, params))
    assert jnp.allclose(out_a, ref_a, rtol=1e-4, atol=1e-4), \
        float(jnp.max(jnp.abs(out_a - ref_a)))

    # Case B: bf16 compute path; odd T exercises time padding, reverse-state
    # masking, multiple sequential time blocks and batch padding.
    key, k2 = jax.random.split(key)
    x_b = jax.random.normal(k2, (3, 10, input_size), jnp.float32)
    prepped_bf16 = prepare_encoder_params(params, compute_dtype=jnp.bfloat16)
    out_b = jax.block_until_ready(
        encoder_forward(x_b, prepped_bf16, max_time_block=4))
    assert out_b.shape == (3, 10, 2 * hidden_size), out_b.shape
    ref_b = jax.block_until_ready(_ref_encoder(x_b, params))
    assert jnp.allclose(out_b, ref_b, rtol=3e-2, atol=3e-2), \
        float(jnp.max(jnp.abs(out_b - ref_b)))

    print("KERNEL_OK")
</pallas_src>

<mosaic_0001>
module attributes {stable_mosaic.version = 11 : i64} {
  func.func @_bilstm_kernel(%arg0: i32, %arg1: memref<8x8x128xf32, #tpu.memory_space<vmem>>, %arg2: memref<8x8x128xf32, #tpu.memory_space<vmem>>, %arg3: memref<2x128xf32, #tpu.memory_space<vmem>>, %arg4: memref<2x32x128xf32, #tpu.memory_space<any>>, %arg5: memref<8x8x32xf32, #tpu.memory_space<vmem>>, %arg6: memref<8x8x32xf32, #tpu.memory_space<vmem>>, %arg7: memref<2x32x128xf32, #tpu.memory_space<vmem>>, %arg8: memref<8x32xf32, #tpu.memory_space<vmem>>, %arg9: memref<8x32xf32, #tpu.memory_space<vmem>>, %arg10: memref<8x32xf32, #tpu.memory_space<vmem>>, %arg11: memref<8x32xf32, #tpu.memory_space<vmem>>) attributes {dimension_semantics = [#tpu.dimension_semantics<arbitrary>], iteration_bounds = array<i64: 1>, scalar_prefetch = 0 : i64, scratch_operands = 5 : i64, tpu.core_type = #tpu.core_type<tc>, window_params = [{transform_indices = @transform_0, window_bounds = array<i64: 8, 8, 128>}, {transform_indices = @transform_1, window_bounds = array<i64: 8, 8, 128>}, {pipeline_mode = #tpu.pipeline_mode<synchronous>, transform_indices = @transform_2, window_bounds = array<i64: 2, 128>}, {}, {transform_indices = @transform_4, window_bounds = array<i64: 8, 8, 32>}, {transform_indices = @transform_5, window_bounds = array<i64: 8, 8, 32>}]} {
    %c0_i32 = arith.constant 0 : i32
    %0 = arith.cmpi eq, %arg0, %c0_i32 : i32
    %1 = arith.extui %0 : i1 to i32
    %c0_i32_0 = arith.constant 0 : i32
    %2 = arith.cmpi ne, %1, %c0_i32_0 : i32
    scf.if %2 {
      "tpu.region"() ({
        %509 = tpu.sem_alloc : memref<!tpu.dma_semaphore, #tpu.memory_space<semaphore_mem>>
        tpu.enqueue_dma source(%arg4 : memref<2x32x128xf32, #tpu.memory_space<any>>) target(%arg7 : memref<2x32x128xf32, #tpu.memory_space<vmem>>) target_semaphore(%509 : memref<!tpu.dma_semaphore, #tpu.memory_space<semaphore_mem>>)
        tpu.wait_dma2 semaphore(%509 : memref<!tpu.dma_semaphore, #tpu.memory_space<semaphore_mem>>) src(%arg4 : memref<2x32x128xf32, #tpu.memory_space<any>>) dst(%arg7 : memref<2x32x128xf32, #tpu.memory_space<vmem>>)
        tpu.yield
      }) : () -> ()
      %cst_226 = arith.constant 0.000000e+00 : f32
      %501 = vector.broadcast %cst_226 : f32 to vector<8x32xf32>
      %c0_227 = arith.constant 0 : index
      %c0_228 = arith.constant 0 : index
      %502 = vector.load %arg8[%c0_227, %c0_228] : memref<8x32xf32, #tpu.memory_space<vmem>>, vector<8x32xf32>
      tpu.vector_store %arg8[%c0_227, %c0_228], %501 {strides = array<i32>} : memref<8x32xf32, #tpu.memory_space<vmem>>, vector<8x32xf32>,
      %cst_229 = arith.constant 0.000000e+00 : f32
      %503 = vector.broadcast %cst_229 : f32 to vector<8x32xf32>
      %c0_230 = arith.constant 0 : index
      %c0_231 = arith.constant 0 : index
      %504 = vector.load %arg9[%c0_230, %c0_231] : memref<8x32xf32, #tpu.memory_space<vmem>>, vector<8x32xf32>
      tpu.vector_store %arg9[%c0_230, %c0_231], %503 {strides = array<i32>} : memref<8x32xf32, #tpu.memory_space<vmem>>, vector<8x32xf32>,
      %cst_232 = arith.constant 0.000000e+00 : f32
      %505 = vector.broadcast %cst_232 : f32 to vector<8x32xf32>
      %c0_233 = arith.constant 0 : index
      %c0_234 = arith.constant 0 : index
      %506 = vector.load %arg10[%c0_233, %c0_234] : memref<8x32xf32, #tpu.memory_space<vmem>>, vector<8x32xf32>
      tpu.vector_store %arg10[%c0_233, %c0_234], %505 {strides = array<i32>} : memref<8x32xf32, #tpu.memory_space<vmem>>, vector<8x32xf32>,
      %cst_235 = arith.constant 0.000000e+00 : f32
      %507 = vector.broadcast %cst_235 : f32 to vector<8x32xf32>
      %c0_236 = arith.constant 0 : index
      %c0_237 = arith.constant 0 : index
      %508 = vector.load %arg11[%c0_236, %c0_237] : memref<8x32xf32, #tpu.memory_space<vmem>>, vector<8x32xf32>
      tpu.vector_store %arg11[%c0_236, %c0_237], %507 {strides = array<i32>} : memref<8x32xf32, #tpu.memory_space<vmem>>, vector<8x32xf32>,
    } else {
    }
    %c0 = arith.constant 0 : index
    %c0_1 = arith.constant 0 : index
    %c0_2 = arith.constant 0 : index
    %3 = vector.load %arg7[%c0, %c0_1, %c0_2] : memref<2x32x128xf32, #tpu.memory_space<vmem>>, vector<1x32x128xf32>
    %4 = vector.shape_cast %3 : vector<1x32x128xf32> to vector<32x128xf32>
    %c1 = arith.constant 1 : index
    %c0_3 = arith.constant 0 : index
    %c0_4 = arith.constant 0 : index
    %5 = vector.load %arg7[%c1, %c0_3, %c0_4] : memref<2x32x128xf32, #tpu.memory_space<vmem>>, vector<1x32x128xf32>
    %6 = vector.shape_cast %5 : vector<1x32x128xf32> to vector<32x128xf32>
    %c0_5 = arith.constant 0 : index
    %c0_6 = arith.constant 0 : index
    %7 = vector.load %arg3[%c0_5, %c0_6] : memref<2x128xf32, #tpu.memory_space<vmem>>, vector<1x128xf32>
    %8 = vector.shape_cast %7 : vector<1x128xf32> to vector<1x128xf32>
    %9 = vector.broadcast %8 : vector<1x128xf32> to vector<8x128xf32>
    %c1_7 = arith.constant 1 : index
    %c0_8 = arith.constant 0 : index
    %10 = vector.load %arg3[%c1_7, %c0_8] : memref<2x128xf32, #tpu.memory_space<vmem>>, vector<1x128xf32>
    %11 = vector.shape_cast %10 : vector<1x128xf32> to vector<1x128xf32>
    %12 = vector.broadcast %11 : vector<1x128xf32> to vector<8x128xf32>
    %c0_9 = arith.constant 0 : index
    %c0_10 = arith.constant 0 : index
    %13 = vector.load %arg8[%c0_9, %c0_10] : memref<8x32xf32, #tpu.memory_space<vmem>>, vector<8x32xf32>
    %c0_11 = arith.constant 0 : index
    %c0_12 = arith.constant 0 : index
    %14 = vector.load %arg9[%c0_11, %c0_12] : memref<8x32xf32, #tpu.memory_space<vmem>>, vector<8x32xf32>
    %c0_13 = arith.constant 0 : index
    %c0_14 = arith.constant 0 : index
    %15 = vector.load %arg10[%c0_13, %c0_14] : memref<8x32xf32, #tpu.memory_space<vmem>>, vector<8x32xf32>
    %c0_15 = arith.constant 0 : index
    %c0_16 = arith.constant 0 : index
    %16 = vector.load %arg11[%c0_15, %c0_16] : memref<8x32xf32, #tpu.memory_space<vmem>>, vector<8x32xf32>
    %c0_17 = arith.constant 0 : index
    %c0_18 = arith.constant 0 : index
    %c0_19 = arith.constant 0 : index
    %17 = vector.load %arg1[%c0_17, %c0_18, %c0_19] : memref<8x8x128xf32, #tpu.memory_space<vmem>>, vector<1x8x128xf32>
    %18 = vector.shape_cast %17 : vector<1x8x128xf32> to vector<8x128xf32>
    %19 = arith.addf %18, %9 : vector<8x128xf32>
    %cst = arith.constant dense<0.000000e+00> : vector<8x128xf32>
    %20 = tpu.matmul %13, %4, %cst {dimension_numbers = #tpu.dot_dimension_numbers<[1], [0], [0], [1], [0, 0, 1, 1], [], []>} : vector<8x32xf32>, vector<32x128xf32>, vector<8x128xf32> -> vector<8x128xf32>
    %21 = arith.addf %19, %20 : vector<8x128xf32>
    %22 = math.tanh %21 : vector<8x128xf32>
    %23 = vector.extract_strided_slice %22 {offsets = [0, 0], sizes = [8, 32], strides = [1, 1]} : vector<8x128xf32> to vector<8x32xf32>
    %cst_20 = arith.constant 5.000000e-01 : f32
    %24 = vector.broadcast %cst_20 : f32 to vector<8x32xf32>
    %25 = arith.mulf %24, %23 : vector<8x32xf32>
    %cst_21 = arith.constant 5.000000e-01 : f32
    %26 = vector.broadcast %cst_21 : f32 to vector<8x32xf32>
    %27 = arith.addf %25, %26 : vector<8x32xf32>
    %28 = vector.extract_strided_slice %22 {offsets = [0, 32], sizes = [8, 32], strides = [1, 1]} : vector<8x128xf32> to vector<8x32xf32>
    %cst_22 = arith.constant 5.000000e-01 : f32
    %29 = vector.broadcast %cst_22 : f32 to vector<8x32xf32>
    %30 = arith.mulf %29, %28 : vector<8x32xf32>
    %cst_23 = arith.constant 5.000000e-01 : f32
    %31 = vector.broadcast %cst_23 : f32 to vector<8x32xf32>
    %32 = arith.addf %30, %31 : vector<8x32xf32>
    %33 = vector.extract_strided_slice %22 {offsets = [0, 64], sizes = [8, 32], strides = [1, 1]} : vector<8x128xf32> to vector<8x32xf32>
    %34 = vector.extract_strided_slice %22 {offsets = [0, 96], sizes = [8, 32], strides = [1, 1]} : vector<8x128xf32> to vector<8x32xf32>
    %cst_24 = arith.constant 5.000000e-01 : f32
    %35 = vector.broadcast %cst_24 : f32 to vector<8x32xf32>
    %36 = arith.mulf %35, %34 : vector<8x32xf32>
    %cst_25 = arith.constant 5.000000e-01 : f32
    %37 = vector.broadcast %cst_25 : f32 to vector<8x32xf32>
    %38 = arith.addf %36, %37 : vector<8x32xf32>
    %39 = arith.mulf %32, %14 : vector<8x32xf32>
    %40 = arith.mulf %27, %33 : vector<8x32xf32>
    %41 = arith.addf %39, %40 : vector<8x32xf32>
    %42 = math.tanh %41 : vector<8x32xf32>
    %43 = arith.mulf %38, %42 : vector<8x32xf32>
    %c0_26 = arith.constant 0 : index
    %c0_27 = arith.constant 0 : index
    %c0_28 = arith.constant 0 : index
    %44 = vector.load %arg5[%c0_26, %c0_27, %c0_28] : memref<8x8x32xf32, #tpu.memory_space<vmem>>, vector<1x8x32xf32>
    %45 = vector.shape_cast %44 : vector<1x8x32xf32> to vector<8x32xf32>
    %46 = vector.shape_cast %43 : vector<8x32xf32> to vector<1x8x32xf32>
    tpu.vector_store %arg5[%c0_26, %c0_27, %c0_28], %46 {strides = array<i32>} : memref<8x8x32xf32, #tpu.memory_space<vmem>>, vector<1x8x32xf32>,
    %c7 = arith.constant 7 : index
    %c0_29 = arith.constant 0 : index
    %c0_30 = arith.constant 0 : index
    %47 = vector.load %arg2[%c7, %c0_29, %c0_30] : memref<8x8x128xf32, #tpu.memory_space<vmem>>, vector<1x8x128xf32>
    %48 = vector.shape_cast %47 : vector<1x8x128xf32> to vector<8x128xf32>
    %49 = arith.addf %48, %12 : vector<8x128xf32>
    %cst_31 = arith.constant dense<0.000000e+00> : vector<8x128xf32>
    %50 = tpu.matmul %15, %6, %cst_31 {dimension_numbers = #tpu.dot_dimension_numbers<[1], [0], [0], [1], [0, 0, 1, 1], [], []>} : vector<8x32xf32>, vector<32x128xf32>, vector<8x128xf32> -> vector<8x128xf32>
    %51 = arith.addf %49, %50 : vector<8x128xf32>
    %52 = math.tanh %51 : vector<8x128xf32>
    %53 = vector.extract_strided_slice %52 {offsets = [0, 0], sizes = [8, 32], strides = [1, 1]} : vector<8x128xf32> to vector<8x32xf32>
    %cst_32 = arith.constant 5.000000e-01 : f32
    %54 = vector.broadcast %cst_32 : f32 to vector<8x32xf32>
    %55 = arith.mulf %54, %53 : vector<8x32xf32>
    %cst_33 = arith.constant 5.000000e-01 : f32
    %56 = vector.broadcast %cst_33 : f32 to vector<8x32xf32>
    %57 = arith.addf %55, %56 : vector<8x32xf32>
    %58 = vector.extract_strided_slice %52 {offsets = [0, 32], sizes = [8, 32], strides = [1, 1]} : vector<8x128xf32> to vector<8x32xf32>
    %cst_34 = arith.constant 5.000000e-01 : f32
    %59 = vector.broadcast %cst_34 : f32 to vector<8x32xf32>
    %60 = arith.mulf %59, %58 : vector<8x32xf32>
    %cst_35 = arith.constant 5.000000e-01 : f32
    %61 = vector.broadcast %cst_35 : f32 to vector<8x32xf32>
    %62 = arith.addf %60, %61 : vector<8x32xf32>
    %63 = vector.extract_strided_slice %52 {offsets = [0, 64], sizes = [8, 32], strides = [1, 1]} : vector<8x128xf32> to vector<8x32xf32>
    %64 = vector.extract_strided_slice %52 {offsets = [0, 96], sizes = [8, 32], strides = [1, 1]} : vector<8x128xf32> to vector<8x32xf32>
    %cst_36 = arith.constant 5.000000e-01 : f32
    %65 = vector.broadcast %cst_36 : f32 to vector<8x32xf32>
    %66 = arith.mulf %65, %64 : vector<8x32xf32>
    %cst_37 = arith.constant 5.000000e-01 : f32
    %67 = vector.broadcast %cst_37 : f32 to vector<8x32xf32>
    %68 = arith.addf %66, %67 : vector<8x32xf32>
    %69 = arith.mulf %62, %16 : vector<8x32xf32>
    %70 = arith.mulf %57, %63 : vector<8x32xf32>
    %71 = arith.addf %69, %70 : vector<8x32xf32>
    %72 = math.tanh %71 : vector<8x32xf32>
    %73 = arith.mulf %68, %72 : vector<8x32xf32>
    %c7_38 = arith.constant 7 : index
    %c0_39 = arith.constant 0 : index
    %c0_40 = arith.constant 0 : index
    %74 = vector.load %arg6[%c7_38, %c0_39, %c0_40] : memref<8x8x32xf32, #tpu.memory_space<vmem>>, vector<1x8x32xf32>
    %75 = vector.shape_cast %74 : vector<1x8x32xf32> to vector<8x32xf32>
    %76 = vector.shape_cast %73 : vector<8x32xf32> to vector<1x8x32xf32>
    tpu.vector_store %arg6[%c7_38, %c0_39, %c0_40], %76 {strides = array<i32>} : memref<8x8x32xf32, #tpu.memory_space<vmem>>, vector<1x8x32xf32>,
    %c1_41 = arith.constant 1 : index
    %c0_42 = arith.constant 0 : index
    %c0_43 = arith.constant 0 : index
    %77 = vector.load %arg1[%c1_41, %c0_42, %c0_43] : memref<8x8x128xf32, #tpu.memory_space<vmem>>, vector<1x8x128xf32>
    %78 = vector.shape_cast %77 : vector<1x8x128xf32> to vector<8x128xf32>
    %79 = arith.addf %78, %9 : vector<8x128xf32>
    %cst_44 = arith.constant dense<0.000000e+00> : vector<8x128xf32>
    %80 = tpu.matmul %43, %4, %cst_44 {dimension_numbers = #tpu.dot_dimension_numbers<[1], [0], [0], [1], [0, 0, 1, 1], [], []>} : vector<8x32xf32>, vector<32x128xf32>, vector<8x128xf32> -> vector<8x128xf32>
    %81 = arith.addf %79, %80 : vector<8x128xf32>
    %82 = math.tanh %81 : vector<8x128xf32>
    %83 = vector.extract_strided_slice %82 {offsets = [0, 0], sizes = [8, 32], strides = [1, 1]} : vector<8x128xf32> to vector<8x32xf32>
    %cst_45 = arith.constant 5.000000e-01 : f32
    %84 = vector.broadcast %cst_45 : f32 to vector<8x32xf32>
    %85 = arith.mulf %84, %83 : vector<8x32xf32>
    %cst_46 = arith.constant 5.000000e-01 : f32
    %86 = vector.broadcast %cst_46 : f32 to vector<8x32xf32>
    %87 = arith.addf %85, %86 : vector<8x32xf32>
    %88 = vector.extract_strided_slice %82 {offsets = [0, 32], sizes = [8, 32], strides = [1, 1]} : vector<8x128xf32> to vector<8x32xf32>
    %cst_47 = arith.constant 5.000000e-01 : f32
    %89 = vector.broadcast %cst_47 : f32 to vector<8x32xf32>
    %90 = arith.mulf %89, %88 : vector<8x32xf32>
    %cst_48 = arith.constant 5.000000e-01 : f32
    %91 = vector.broadcast %cst_48 : f32 to vector<8x32xf32>
    %92 = arith.addf %90, %91 : vector<8x32xf32>
    %93 = vector.extract_strided_slice %82 {offsets = [0, 64], sizes = [8, 32], strides = [1, 1]} : vector<8x128xf32> to vector<8x32xf32>
    %94 = vector.extract_strided_slice %82 {offsets = [0, 96], sizes = [8, 32], strides = [1, 1]} : vector<8x128xf32> to vector<8x32xf32>
    %cst_49 = arith.constant 5.000000e-01 : f32
    %95 = vector.broadcast %cst_49 : f32 to vector<8x32xf32>
    %96 = arith.mulf %95, %94 : vector<8x32xf32>
    %cst_50 = arith.constant 5.000000e-01 : f32
    %97 = vector.broadcast %cst_50 : f32 to vector<8x32xf32>
    %98 = arith.addf %96, %97 : vector<8x32xf32>
    %99 = arith.mulf %92, %41 : vector<8x32xf32>
    %100 = arith.mulf %87, %93 : vector<8x32xf32>
    %101 = arith.addf %99, %100 : vector<8x32xf32>
    %102 = math.tanh %101 : vector<8x32xf32>
    %103 = arith.mulf %98, %102 : vector<8x32xf32>
    %c1_51 = arith.constant 1 : index
    %c0_52 = arith.constant 0 : index
    %c0_53 = arith.constant 0 : index
    %104 = vector.load %arg5[%c1_51, %c0_52, %c0_53] : memref<8x8x32xf32, #tpu.memory_space<vmem>>, vector<1x8x32xf32>
    %105 = vector.shape_cast %104 : vector<1x8x32xf32> to vector<8x32xf32>
    %106 = vector.shape_cast %103 : vector<8x32xf32> to vector<1x8x32xf32>
    tpu.vector_store %arg5[%c1_51, %c0_52, %c0_53], %106 {strides = array<i32>} : memref<8x8x32xf32, #tpu.memory_space<vmem>>, vector<1x8x32xf32>,
    %c6 = arith.constant 6 : index
    %c0_54 = arith.constant 0 : index
    %c0_55 = arith.constant 0 : index
    %107 = vector.load %arg2[%c6, %c0_54, %c0_55] : memref<8x8x128xf32, #tpu.memory_space<vmem>>, vector<1x8x128xf32>
    %108 = vector.shape_cast %107 : vector<1x8x128xf32> to vector<8x128xf32>
    %109 = arith.addf %108, %12 : vector<8x128xf32>
    %cst_56 = arith.constant dense<0.000000e+00> : vector<8x128xf32>
    %110 = tpu.matmul %73, %6, %cst_56 {dimension_numbers = #tpu.dot_dimension_numbers<[1], [0], [0], [1], [0, 0, 1, 1], [], []>} : vector<8x32xf32>, vector<32x128xf32>, vector<8x128xf32> -> vector<8x128xf32>
    %111 = arith.addf %109, %110 : vector<8x128xf32>
    %112 = math.tanh %111 : vector<8x128xf32>
    %113 = vector.extract_strided_slice %112 {offsets = [0, 0], sizes = [8, 32], strides = [1, 1]} : vector<8x128xf32> to vector<8x32xf32>
    %cst_57 = arith.constant 5.000000e-01 : f32
    %114 = vector.broadcast %cst_57 : f32 to vector<8x32xf32>
    %115 = arith.mulf %114, %113 : vector<8x32xf32>
    %cst_58 = arith.constant 5.000000e-01 : f32
    %116 = vector.broadcast %cst_58 : f32 to vector<8x32xf32>
    %117 = arith.addf %115, %116 : vector<8x32xf32>
    %118 = vector.extract_strided_slice %112 {offsets = [0, 32], sizes = [8, 32], strides = [1, 1]} : vector<8x128xf32> to vector<8x32xf32>
    %cst_59 = arith.constant 5.000000e-01 : f32
    %119 = vector.broadcast %cst_59 : f32 to vector<8x32xf32>
    %120 = arith.mulf %119, %118 : vector<8x32xf32>
    %cst_60 = arith.constant 5.000000e-01 : f32
    %121 = vector.broadcast %cst_60 : f32 to vector<8x32xf32>
    %122 = arith.addf %120, %121 : vector<8x32xf32>
    %123 = vector.extract_strided_slice %112 {offsets = [0, 64], sizes = [8, 32], strides = [1, 1]} : vector<8x128xf32> to vector<8x32xf32>
    %124 = vector.extract_strided_slice %112 {offsets = [0, 96], sizes = [8, 32], strides = [1, 1]} : vector<8x128xf32> to vector<8x32xf32>
    %cst_61 = arith.constant 5.000000e-01 : f32
    %125 = vector.broadcast %cst_61 : f32 to vector<8x32xf32>
    %126 = arith.mulf %125, %124 : vector<8x32xf32>
    %cst_62 = arith.constant 5.000000e-01 : f32
    %127 = vector.broadcast %cst_62 : f32 to vector<8x32xf32>
    %128 = arith.addf %126, %127 : vector<8x32xf32>
    %129 = arith.mulf %122, %71 : vector<8x32xf32>
    %130 = arith.mulf %117, %123 : vector<8x32xf32>
    %131 = arith.addf %129, %130 : vector<8x32xf32>
    %132 = math.tanh %131 : vector<8x32xf32>
    %133 = arith.mulf %128, %132 : vector<8x32xf32>
    %c6_63 = arith.constant 6 : index
    %c0_64 = arith.constant 0 : index
    %c0_65 = arith.constant 0 : index
    %134 = vector.load %arg6[%c6_63, %c0_64, %c0_65] : memref<8x8x32xf32, #tpu.memory_space<vmem>>, vector<1x8x32xf32>
    %135 = vector.shape_cast %134 : vector<1x8x32xf32> to vector<8x32xf32>
    %136 = vector.shape_cast %133 : vector<8x32xf32> to vector<1x8x32xf32>
    tpu.vector_store %arg6[%c6_63, %c0_64, %c0_65], %136 {strides = array<i32>} : memref<8x8x32xf32, #tpu.memory_space<vmem>>, vector<1x8x32xf32>,
    %c2 = arith.constant 2 : index
    %c0_66 = arith.constant 0 : index
    %c0_67 = arith.constant 0 : index
    %137 = vector.load %arg1[%c2, %c0_66, %c0_67] : memref<8x8x128xf32, #tpu.memory_space<vmem>>, vector<1x8x128xf32>
    %138 = vector.shape_cast %137 : vector<1x8x128xf32> to vector<8x128xf32>
    %139 = arith.addf %138, %9 : vector<8x128xf32>
    %cst_68 = arith.constant dense<0.000000e+00> : vector<8x128xf32>
    %140 = tpu.matmul %103, %4, %cst_68 {dimension_numbers = #tpu.dot_dimension_numbers<[1], [0], [0], [1], [0, 0, 1, 1], [], []>} : vector<8x32xf32>, vector<32x128xf32>, vector<8x128xf32> -> vector<8x128xf32>
    %141 = arith.addf %139, %140 : vector<8x128xf32>
    %142 = math.tanh %141 : vector<8x128xf32>
    %143 = vector.extract_strided_slice %142 {offsets = [0, 0], sizes = [8, 32], strides = [1, 1]} : vector<8x128xf32> to vector<8x32xf32>
    %cst_69 = arith.constant 5.000000e-01 : f32
    %144 = vector.broadcast %cst_69 : f32 to vector<8x32xf32>
    %145 = arith.mulf %144, %143 : vector<8x32xf32>
    %cst_70 = arith.constant 5.000000e-01 : f32
    %146 = vector.broadcast %cst_70 : f32 to vector<8x32xf32>
    %147 = arith.addf %145, %146 : vector<8x32xf32>
    %148 = vector.extract_strided_slice %142 {offsets = [0, 32], sizes = [8, 32], strides = [1, 1]} : vector<8x128xf32> to vector<8x32xf32>
    %cst_71 = arith.constant 5.000000e-01 : f32
    %149 = vector.broadcast %cst_71 : f32 to vector<8x32xf32>
    %150 = arith.mulf %149, %148 : vector<8x32xf32>
    %cst_72 = arith.constant 5.000000e-01 : f32
    %151 = vector.broadcast %cst_72 : f32 to vector<8x32xf32>
    %152 = arith.addf %150, %151 : vector<8x32xf32>
    %153 = vector.extract_strided_slice %142 {offsets = [0, 64], sizes = [8, 32], strides = [1, 1]} : vector<8x128xf32> to vector<8x32xf32>
    %154 = vector.extract_strided_slice %142 {offsets = [0, 96], sizes = [8, 32], strides = [1, 1]} : vector<8x128xf32> to vector<8x32xf32>
    %cst_73 = arith.constant 5.000000e-01 : f32
    %155 = vector.broadcast %cst_73 : f32 to vector<8x32xf32>
    %156 = arith.mulf %155, %154 : vector<8x32xf32>
    %cst_74 = arith.constant 5.000000e-01 : f32
    %157 = vector.broadcast %cst_74 : f32 to vector<8x32xf32>
    %158 = arith.addf %156, %157 : vector<8x32xf32>
    %159 = arith.mulf %152, %101 : vector<8x32xf32>
    %160 = arith.mulf %147, %153 : vector<8x32xf32>
    %161 = arith.addf %159, %160 : vector<8x32xf32>
    %162 = math.tanh %161 : vector<8x32xf32>
    %163 = arith.mulf %158, %162 : vector<8x32xf32>
    %c2_75 = arith.constant 2 : index
    %c0_76 = arith.constant 0 : index
    %c0_77 = arith.constant 0 : index
    %164 = vector.load %arg5[%c2_75, %c0_76, %c0_77] : memref<8x8x32xf32, #tpu.memory_space<vmem>>, vector<1x8x32xf32>
    %165 = vector.shape_cast %164 : vector<1x8x32xf32> to vector<8x32xf32>
    %166 = vector.shape_cast %163 : vector<8x32xf32> to vector<1x8x32xf32>
    tpu.vector_store %arg5[%c2_75, %c0_76, %c0_77], %166 {strides = array<i32>} : memref<8x8x32xf32, #tpu.memory_space<vmem>>, vector<1x8x32xf32>,
    %c5 = arith.constant 5 : index
    %c0_78 = arith.constant 0 : index
    %c0_79 = arith.constant 0 : index
    %167 = vector.load %arg2[%c5, %c0_78, %c0_79] : memref<8x8x128xf32, #tpu.memory_space<vmem>>, vector<1x8x128xf32>
    %168 = vector.shape_cast %167 : vector<1x8x128xf32> to vector<8x128xf32>
    %169 = arith.addf %168, %12 : vector<8x128xf32>
    %cst_80 = arith.constant dense<0.000000e+00> : vector<8x128xf32>
    %170 = tpu.matmul %133, %6, %cst_80 {dimension_numbers = #tpu.dot_dimension_numbers<[1], [0], [0], [1], [0, 0, 1, 1], [], []>} : vector<8x32xf32>, vector<32x128xf32>, vector<8x128xf32> -> vector<8x128xf32>
    %171 = arith.addf %169, %170 : vector<8x128xf32>
    %172 = math.tanh %171 : vector<8x128xf32>
    %173 = vector.extract_strided_slice %172 {offsets = [0, 0], sizes = [8, 32], strides = [1, 1]} : vector<8x128xf32> to vector<8x32xf32>
    %cst_81 = arith.constant 5.000000e-01 : f32
    %174 = vector.broadcast %cst_81 : f32 to vector<8x32xf32>
    %175 = arith.mulf %174, %173 : vector<8x32xf32>
    %cst_82 = arith.constant 5.000000e-01 : f32
    %176 = vector.broadcast %cst_82 : f32 to vector<8x32xf32>
    %177 = arith.addf %175, %176 : vector<8x32xf32>
    %178 = vector.extract_strided_slice %172 {offsets = [0, 32], sizes = [8, 32], strides = [1, 1]} : vector<8x128xf32> to vector<8x32xf32>
    %cst_83 = arith.constant 5.000000e-01 : f32
    %179 = vector.broadcast %cst_83 : f32 to vector<8x32xf32>
    %180 = arith.mulf %179, %178 : vector<8x32xf32>
    %cst_84 = arith.constant 5.000000e-01 : f32
    %181 = vector.broadcast %cst_84 : f32 to vector<8x32xf32>
    %182 = arith.addf %180, %181 : vector<8x32xf32>
    %183 = vector.extract_strided_slice %172 {offsets = [0, 64], sizes = [8, 32], strides = [1, 1]} : vector<8x128xf32> to vector<8x32xf32>
    %184 = vector.extract_strided_slice %172 {offsets = [0, 96], sizes = [8, 32], strides = [1, 1]} : vector<8x128xf32> to vector<8x32xf32>
    %cst_85 = arith.constant 5.000000e-01 : f32
    %185 = vector.broadcast %cst_85 : f32 to vector<8x32xf32>
    %186 = arith.mulf %185, %184 : vector<8x32xf32>
    %cst_86 = arith.constant 5.000000e-01 : f32
    %187 = vector.broadcast %cst_86 : f32 to vector<8x32xf32>
    %188 = arith.addf %186, %187 : vector<8x32xf32>
    %189 = arith.mulf %182, %131 : vector<8x32xf32>
    %190 = arith.mulf %177, %183 : vector<8x32xf32>
    %191 = arith.addf %189, %190 : vector<8x32xf32>
    %192 = math.tanh %191 : vector<8x32xf32>
    %193 = arith.mulf %188, %192 : vector<8x32xf32>
    %c5_87 = arith.constant 5 : index
    %c0_88 = arith.constant 0 : index
    %c0_89 = arith.constant 0 : index
    %194 = vector.load %arg6[%c5_87, %c0_88, %c0_89] : memref<8x8x32xf32, #tpu.memory_space<vmem>>, vector<1x8x32xf32>
    %195 = vector.shape_cast %194 : vector<1x8x32xf32> to vector<8x32xf32>
    %196 = vector.shape_cast %193 : vector<8x32xf32> to vector<1x8x32xf32>
    tpu.vector_store %arg6[%c5_87, %c0_88, %c0_89], %196 {strides = array<i32>} : memref<8x8x32xf32, #tpu.memory_space<vmem>>, vector<1x8x32xf32>,
    %c3 = arith.constant 3 : index
    %c0_90 = arith.constant 0 : index
    %c0_91 = arith.constant 0 : index
    %197 = vector.load %arg1[%c3, %c0_90, %c0_91] : memref<8x8x128xf32, #tpu.memory_space<vmem>>, vector<1x8x128xf32>
    %198 = vector.shape_cast %197 : vector<1x8x128xf32> to vector<8x128xf32>
    %199 = arith.addf %198, %9 : vector<8x128xf32>
    %cst_92 = arith.constant dense<0.000000e+00> : vector<8x128xf32>
    %200 = tpu.matmul %163, %4, %cst_92 {dimension_numbers = #tpu.dot_dimension_numbers<[1], [0], [0], [1], [0, 0, 1, 1], [], []>} : vector<8x32xf32>, vector<32x128xf32>, vector<8x128xf32> -> vector<8x128xf32>
    %201 = arith.addf %199, %200 : vector<8x128xf32>
    %202 = math.tanh %201 : vector<8x128xf32>
    %203 = vector.extract_strided_slice %202 {offsets = [0, 0], sizes = [8, 32], strides = [1, 1]} : vector<8x128xf32> to vector<8x32xf32>
    %cst_93 = arith.constant 5.000000e-01 : f32
    %204 = vector.broadcast %cst_93 : f32 to vector<8x32xf32>
    %205 = arith.mulf %204, %203 : vector<8x32xf32>
    %cst_94 = arith.constant 5.000000e-01 : f32
    %206 = vector.broadcast %cst_94 : f32 to vector<8x32xf32>
    %207 = arith.addf %205, %206 : vector<8x32xf32>
    %208 = vector.extract_strided_slice %202 {offsets = [0, 32], sizes = [8, 32], strides = [1, 1]} : vector<8x128xf32> to vector<8x32xf32>
    %cst_95 = arith.constant 5.000000e-01 : f32
    %209 = vector.broadcast %cst_95 : f32 to vector<8x32xf32>
    %210 = arith.mulf %209, %208 : vector<8x32xf32>
    %cst_96 = arith.constant 5.000000e-01 : f32
    %211 = vector.broadcast %cst_96 : f32 to vector<8x32xf32>
    %212 = arith.addf %210, %211 : vector<8x32xf32>
    %213 = vector.extract_strided_slice %202 {offsets = [0, 64], sizes = [8, 32], strides = [1, 1]} : vector<8x128xf32> to vector<8x32xf32>
    %214 = vector.extract_strided_slice %202 {offsets = [0, 96], sizes = [8, 32], strides = [1, 1]} : vector<8x128xf32> to vector<8x32xf32>
    %cst_97 = arith.constant 5.000000e-01 : f32
    %215 = vector.broadcast %cst_97 : f32 to vector<8x32xf32>
    %216 = arith.mulf %215, %214 : vector<8x32xf32>
    %cst_98 = arith.constant 5.000000e-01 : f32
    %217 = vector.broadcast %cst_98 : f32 to vector<8x32xf32>
    %218 = arith.addf %216, %217 : vector<8x32xf32>
    %219 = arith.mulf %212, %161 : vector<8x32xf32>
    %220 = arith.mulf %207, %213 : vector<8x32xf32>
    %221 = arith.addf %219, %220 : vector<8x32xf32>
    %222 = math.tanh %221 : vector<8x32xf32>
    %223 = arith.mulf %218, %222 : vector<8x32xf32>
    %c3_99 = arith.constant 3 : index
    %c0_100 = arith.constant 0 : index
    %c0_101 = arith.constant 0 : index
    %224 = vector.load %arg5[%c3_99, %c0_100, %c0_101] : memref<8x8x32xf32, #tpu.memory_space<vmem>>, vector<1x8x32xf32>
    %225 = vector.shape_cast %224 : vector<1x8x32xf32> to vector<8x32xf32>
    %226 = vector.shape_cast %223 : vector<8x32xf32> to vector<1x8x32xf32>
    tpu.vector_store %arg5[%c3_99, %c0_100, %c0_101], %226 {strides = array<i32>} : memref<8x8x32xf32, #tpu.memory_space<vmem>>, vector<1x8x32xf32>,
    %c4 = arith.constant 4 : index
    %c0_102 = arith.constant 0 : index
    %c0_103 = arith.constant 0 : index
    %227 = vector.load %arg2[%c4, %c0_102, %c0_103] : memref<8x8x128xf32, #tpu.memory_space<vmem>>, vector<1x8x128xf32>
    %228 = vector.shape_cast %227 : vector<1x8x128xf32> to vector<8x128xf32>
    %229 = arith.addf %228, %12 : vector<8x128xf32>
    %cst_104 = arith.constant dense<0.000000e+00> : vector<8x128xf32>
    %230 = tpu.matmul %193, %6, %cst_104 {dimension_numbers = #tpu.dot_dimension_numbers<[1], [0], [0], [1], [0, 0, 1, 1], [], []>} : vector<8x32xf32>, vector<32x128xf32>, vector<8x128xf32> -> vector<8x128xf32>
    %231 = arith.addf %229, %230 : vector<8x128xf32>
    %232 = math.tanh %231 : vector<8x128xf32>
    %233 = vector.extract_strided_slice %232 {offsets = [0, 0], sizes = [8, 32], strides = [1, 1]} : vector<8x128xf32> to vector<8x32xf32>
    %cst_105 = arith.constant 5.000000e-01 : f32
    %234 = vector.broadcast %cst_105 : f32 to vector<8x32xf32>
    %235 = arith.mulf %234, %233 : vector<8x32xf32>
    %cst_106 = arith.constant 5.000000e-01 : f32
    %236 = vector.broadcast %cst_106 : f32 to vector<8x32xf32>
    %237 = arith.addf %235, %236 : vector<8x32xf32>
    %238 = vector.extract_strided_slice %232 {offsets = [0, 32], sizes = [8, 32], strides = [1, 1]} : vector<8x128xf32> to vector<8x32xf32>
    %cst_107 = arith.constant 5.000000e-01 : f32
    %239 = vector.broadcast %cst_107 : f32 to vector<8x32xf32>
    %240 = arith.mulf %239, %238 : vector<8x32xf32>
    %cst_108 = arith.constant 5.000000e-01 : f32
    %241 = vector.broadcast %cst_108 : f32 to vector<8x32xf32>
    %242 = arith.addf %240, %241 : vector<8x32xf32>
    %243 = vector.extract_strided_slice %232 {offsets = [0, 64], sizes = [8, 32], strides = [1, 1]} : vector<8x128xf32> to vector<8x32xf32>
    %244 = vector.extract_strided_slice %232 {offsets = [0, 96], sizes = [8, 32], strides = [1, 1]} : vector<8x128xf32> to vector<8x32xf32>
    %cst_109 = arith.constant 5.000000e-01 : f32
    %245 = vector.broadcast %cst_109 : f32 to vector<8x32xf32>
    %246 = arith.mulf %245, %244 : vector<8x32xf32>
    %cst_110 = arith.constant 5.000000e-01 : f32
    %247 = vector.broadcast %cst_110 : f32 to vector<8x32xf32>
    %248 = arith.addf %246, %247 : vector<8x32xf32>
    %249 = arith.mulf %242, %191 : vector<8x32xf32>
    %250 = arith.mulf %237, %243 : vector<8x32xf32>
    %251 = arith.addf %249, %250 : vector<8x32xf32>
    %252 = math.tanh %251 : vector<8x32xf32>
    %253 = arith.mulf %248, %252 : vector<8x32xf32>
    %c4_111 = arith.constant 4 : index
    %c0_112 = arith.constant 0 : index
    %c0_113 = arith.constant 0 : index
    %254 = vector.load %arg6[%c4_111, %c0_112, %c0_113] : memref<8x8x32xf32, #tpu.memory_space<vmem>>, vector<1x8x32xf32>
    %255 = vector.shape_cast %254 : vector<1x8x32xf32> to vector<8x32xf32>
    %256 = vector.shape_cast %253 : vector<8x32xf32> to vector<1x8x32xf32>
    tpu.vector_store %arg6[%c4_111, %c0_112, %c0_113], %256 {strides = array<i32>} : memref<8x8x32xf32, #tpu.memory_space<vmem>>, vector<1x8x32xf32>,
    %c4_114 = arith.constant 4 : index
    %c0_115 = arith.constant 0 : index
    %c0_116 = arith.constant 0 : index
    %257 = vector.load %arg1[%c4_114, %c0_115, %c0_116] : memref<8x8x128xf32, #tpu.memory_space<vmem>>, vector<1x8x128xf32>
    %258 = vector.shape_cast %257 : vector<1x8x128xf32> to vector<8x128xf32>
    %259 = arith.addf %258, %9 : vector<8x128xf32>
    %cst_117 = arith.constant dense<0.000000e+00> : vector<8x128xf32>
    %260 = tpu.matmul %223, %4, %cst_117 {dimension_numbers = #tpu.dot_dimension_numbers<[1], [0], [0], [1], [0, 0, 1, 1], [], []>} : vector<8x32xf32>, vector<32x128xf32>, vector<8x128xf32> -> vector<8x128xf32>
    %261 = arith.addf %259, %260 : vector<8x128xf32>
    %262 = math.tanh %261 : vector<8x128xf32>
    %263 = vector.extract_strided_slice %262 {offsets = [0, 0], sizes = [8, 32], strides = [1, 1]} : vector<8x128xf32> to vector<8x32xf32>
    %cst_118 = arith.constant 5.000000e-01 : f32
    %264 = vector.broadcast %cst_118 : f32 to vector<8x32xf32>
    %265 = arith.mulf %264, %263 : vector<8x32xf32>
    %cst_119 = arith.constant 5.000000e-01 : f32
    %266 = vector.broadcast %cst_119 : f32 to vector<8x32xf32>
    %267 = arith.addf %265, %266 : vector<8x32xf32>
    %268 = vector.extract_strided_slice %262 {offsets = [0, 32], sizes = [8, 32], strides = [1, 1]} : vector<8x128xf32> to vector<8x32xf32>
    %cst_120 = arith.constant 5.000000e-01 : f32
    %269 = vector.broadcast %cst_120 : f32 to vector<8x32xf32>
    %270 = arith.mulf %269, %268 : vector<8x32xf32>
    %cst_121 = arith.constant 5.000000e-01 : f32
    %271 = vector.broadcast %cst_121 : f32 to vector<8x32xf32>
    %272 = arith.addf %270, %271 : vector<8x32xf32>
    %273 = vector.extract_strided_slice %262 {offsets = [0, 64], sizes = [8, 32], strides = [1, 1]} : vector<8x128xf32> to vector<8x32xf32>
    %274 = vector.extract_strided_slice %262 {offsets = [0, 96], sizes = [8, 32], strides = [1, 1]} : vector<8x128xf32> to vector<8x32xf32>
    %cst_122 = arith.constant 5.000000e-01 : f32
    %275 = vector.broadcast %cst_122 : f32 to vector<8x32xf32>
    %276 = arith.mulf %275, %274 : vector<8x32xf32>
    %cst_123 = arith.constant 5.000000e-01 : f32
    %277 = vector.broadcast %cst_123 : f32 to vector<8x32xf32>
    %278 = arith.addf %276, %277 : vector<8x32xf32>
    %279 = arith.mulf %272, %221 : vector<8x32xf32>
    %280 = arith.mulf %267, %273 : vector<8x32xf32>
    %281 = arith.addf %279, %280 : vector<8x32xf32>
    %282 = math.tanh %281 : vector<8x32xf32>
    %283 = arith.mulf %278, %282 : vector<8x32xf32>
    %c4_124 = arith.constant 4 : index
    %c0_125 = arith.constant 0 : index
    %c0_126 = arith.constant 0 : index
    %284 = vector.load %arg5[%c4_124, %c0_125, %c0_126] : memref<8x8x32xf32, #tpu.memory_space<vmem>>, vector<1x8x32xf32>
    %285 = vector.shape_cast %284 : vector<1x8x32xf32> to vector<8x32xf32>
    %286 = vector.shape_cast %283 : vector<8x32xf32> to vector<1x8x32xf32>
    tpu.vector_store %arg5[%c4_124, %c0_125, %c0_126], %286 {strides = array<i32>} : memref<8x8x32xf32, #tpu.memory_space<vmem>>, vector<1x8x32xf32>,
    %c3_127 = arith.constant 3 : index
    %c0_128 = arith.constant 0 : index
    %c0_129 = arith.constant 0 : index
    %287 = vector.load %arg2[%c3_127, %c0_128, %c0_129] : memref<8x8x128xf32, #tpu.memory_space<vmem>>, vector<1x8x128xf32>
    %288 = vector.shape_cast %287 : vector<1x8x128xf32> to vector<8x128xf32>
    %289 = arith.addf %288, %12 : vector<8x128xf32>
    %cst_130 = arith.constant dense<0.000000e+00> : vector<8x128xf32>
    %290 = tpu.matmul %253, %6, %cst_130 {dimension_numbers = #tpu.dot_dimension_numbers<[1], [0], [0], [1], [0, 0, 1, 1], [], []>} : vector<8x32xf32>, vector<32x128xf32>, vector<8x128xf32> -> vector<8x128xf32>
    %291 = arith.addf %289, %290 : vector<8x128xf32>
    %292 = math.tanh %291 : vector<8x128xf32>
    %293 = vector.extract_strided_slice %292 {offsets = [0, 0], sizes = [8, 32], strides = [1, 1]} : vector<8x128xf32> to vector<8x32xf32>
    %cst_131 = arith.constant 5.000000e-01 : f32
    %294 = vector.broadcast %cst_131 : f32 to vector<8x32xf32>
    %295 = arith.mulf %294, %293 : vector<8x32xf32>
    %cst_132 = arith.constant 5.000000e-01 : f32
    %296 = vector.broadcast %cst_132 : f32 to vector<8x32xf32>
    %297 = arith.addf %295, %296 : vector<8x32xf32>
    %298 = vector.extract_strided_slice %292 {offsets = [0, 32], sizes = [8, 32], strides = [1, 1]} : vector<8x128xf32> to vector<8x32xf32>
    %cst_133 = arith.constant 5.000000e-01 : f32
    %299 = vector.broadcast %cst_133 : f32 to vector<8x32xf32>
    %300 = arith.mulf %299, %298 : vector<8x32xf32>
    %cst_134 = arith.constant 5.000000e-01 : f32
    %301 = vector.broadcast %cst_134 : f32 to vector<8x32xf32>
    %302 = arith.addf %300, %301 : vector<8x32xf32>
    %303 = vector.extract_strided_slice %292 {offsets = [0, 64], sizes = [8, 32], strides = [1, 1]} : vector<8x128xf32> to vector<8x32xf32>
    %304 = vector.extract_strided_slice %292 {offsets = [0, 96], sizes = [8, 32], strides = [1, 1]} : vector<8x128xf32> to vector<8x32xf32>
    %cst_135 = arith.constant 5.000000e-01 : f32
    %305 = vector.broadcast %cst_135 : f32 to vector<8x32xf32>
    %306 = arith.mulf %305, %304 : vector<8x32xf32>
    %cst_136 = arith.constant 5.000000e-01 : f32
    %307 = vector.broadcast %cst_136 : f32 to vector<8x32xf32>
    %308 = arith.addf %306, %307 : vector<8x32xf32>
    %309 = arith.mulf %302, %251 : vector<8x32xf32>
    %310 = arith.mulf %297, %303 : vector<8x32xf32>
    %311 = arith.addf %309, %310 : vector<8x32xf32>
    %312 = math.tanh %311 : vector<8x32xf32>
    %313 = arith.mulf %308, %312 : vector<8x32xf32>
    %c3_137 = arith.constant 3 : index
    %c0_138 = arith.constant 0 : index
    %c0_139 = arith.constant 0 : index
    %314 = vector.load %arg6[%c3_137, %c0_138, %c0_139] : memref<8x8x32xf32, #tpu.memory_space<vmem>>, vector<1x8x32xf32>
    %315 = vector.shape_cast %314 : vector<1x8x32xf32> to vector<8x32xf32>
    %316 = vector.shape_cast %313 : vector<8x32xf32> to vector<1x8x32xf32>
    tpu.vector_store %arg6[%c3_137, %c0_138, %c0_139], %316 {strides = array<i32>} : memref<8x8x32xf32, #tpu.memory_space<vmem>>, vector<1x8x32xf32>,
    %c5_140 = arith.constant 5 : index
    %c0_141 = arith.constant 0 : index
    %c0_142 = arith.constant 0 : index
    %317 = vector.load %arg1[%c5_140, %c0_141, %c0_142] : memref<8x8x128xf32, #tpu.memory_space<vmem>>, vector<1x8x128xf32>
    %318 = vector.shape_cast %317 : vector<1x8x128xf32> to vector<8x128xf32>
    %319 = arith.addf %318, %9 : vector<8x128xf32>
    %cst_143 = arith.constant dense<0.000000e+00> : vector<8x128xf32>
    %320 = tpu.matmul %283, %4, %cst_143 {dimension_numbers = #tpu.dot_dimension_numbers<[1], [0], [0], [1], [0, 0, 1, 1], [], []>} : vector<8x32xf32>, vector<32x128xf32>, vector<8x128xf32> -> vector<8x128xf32>
    %321 = arith.addf %319, %320 : vector<8x128xf32>
    %322 = math.tanh %321 : vector<8x128xf32>
    %323 = vector.extract_strided_slice %322 {offsets = [0, 0], sizes = [8, 32], strides = [1, 1]} : vector<8x128xf32> to vector<8x32xf32>
    %cst_144 = arith.constant 5.000000e-01 : f32
    %324 = vector.broadcast %cst_144 : f32 to vector<8x32xf32>
    %325 = arith.mulf %324, %323 : vector<8x32xf32>
    %cst_145 = arith.constant 5.000000e-01 : f32
    %326 = vector.broadcast %cst_145 : f32 to vector<8x32xf32>
    %327 = arith.addf %325, %326 : vector<8x32xf32>
    %328 = vector.extract_strided_slice %322 {offsets = [0, 32], sizes = [8, 32], strides = [1, 1]} : vector<8x128xf32> to vector<8x32xf32>
    %cst_146 = arith.constant 5.000000e-01 : f32
    %329 = vector.broadcast %cst_146 : f32 to vector<8x32xf32>
    %330 = arith.mulf %329, %328 : vector<8x32xf32>
    %cst_147 = arith.constant 5.000000e-01 : f32
    %331 = vector.broadcast %cst_147 : f32 to vector<8x32xf32>
    %332 = arith.addf %330, %331 : vector<8x32xf32>
    %333 = vector.extract_strided_slice %322 {offsets = [0, 64], sizes = [8, 32], strides = [1, 1]} : vector<8x128xf32> to vector<8x32xf32>
    %334 = vector.extract_strided_slice %322 {offsets = [0, 96], sizes = [8, 32], strides = [1, 1]} : vector<8x128xf32> to vector<8x32xf32>
    %cst_148 = arith.constant 5.000000e-01 : f32
    %335 = vector.broadcast %cst_148 : f32 to vector<8x32xf32>
    %336 = arith.mulf %335, %334 : vector<8x32xf32>
    %cst_149 = arith.constant 5.000000e-01 : f32
    %337 = vector.broadcast %cst_149 : f32 to vector<8x32xf32>
    %338 = arith.addf %336, %337 : vector<8x32xf32>
    %339 = arith.mulf %332, %281 : vector<8x32xf32>
    %340 = arith.mulf %327, %333 : vector<8x32xf32>
    %341 = arith.addf %339, %340 : vector<8x32xf32>
    %342 = math.tanh %341 : vector<8x32xf32>
    %343 = arith.mulf %338, %342 : vector<8x32xf32>
    %c5_150 = arith.constant 5 : index
    %c0_151 = arith.constant 0 : index
    %c0_152 = arith.constant 0 : index
    %344 = vector.load %arg5[%c5_150, %c0_151, %c0_152] : memref<8x8x32xf32, #tpu.memory_space<vmem>>, vector<1x8x32xf32>
    %345 = vector.shape_cast %344 : vector<1x8x32xf32> to vector<8x32xf32>
    %346 = vector.shape_cast %343 : vector<8x32xf32> to vector<1x8x32xf32>
    tpu.vector_store %arg5[%c5_150, %c0_151, %c0_152], %346 {strides = array<i32>} : memref<8x8x32xf32, #tpu.memory_space<vmem>>, vector<1x8x32xf32>,
    %c2_153 = arith.constant 2 : index
    %c0_154 = arith.constant 0 : index
    %c0_155 = arith.constant 0 : index
    %347 = vector.load %arg2[%c2_153, %c0_154, %c0_155] : memref<8x8x128xf32, #tpu.memory_space<vmem>>, vector<1x8x128xf32>
    %348 = vector.shape_cast %347 : vector<1x8x128xf32> to vector<8x128xf32>
    %349 = arith.addf %348, %12 : vector<8x128xf32>
    %cst_156 = arith.constant dense<0.000000e+00> : vector<8x128xf32>
    %350 = tpu.matmul %313, %6, %cst_156 {dimension_numbers = #tpu.dot_dimension_numbers<[1], [0], [0], [1], [0, 0, 1, 1], [], []>} : vector<8x32xf32>, vector<32x128xf32>, vector<8x128xf32> -> vector<8x128xf32>
    %351 = arith.addf %349, %350 : vector<8x128xf32>
    %352 = math.tanh %351 : vector<8x128xf32>
    %353 = vector.extract_strided_slice %352 {offsets = [0, 0], sizes = [8, 32], strides = [1, 1]} : vector<8x128xf32> to vector<8x32xf32>
    %cst_157 = arith.constant 5.000000e-01 : f32
    %354 = vector.broadcast %cst_157 : f32 to vector<8x32xf32>
    %355 = arith.mulf %354, %353 : vector<8x32xf32>
    %cst_158 = arith.constant 5.000000e-01 : f32
    %356 = vector.broadcast %cst_158 : f32 to vector<8x32xf32>
    %357 = arith.addf %355, %356 : vector<8x32xf32>
    %358 = vector.extract_strided_slice %352 {offsets = [0, 32], sizes = [8, 32], strides = [1, 1]} : vector<8x128xf32> to vector<8x32xf32>
    %cst_159 = arith.constant 5.000000e-01 : f32
    %359 = vector.broadcast %cst_159 : f32 to vector<8x32xf32>
    %360 = arith.mulf %359, %358 : vector<8x32xf32>
    %cst_160 = arith.constant 5.000000e-01 : f32
    %361 = vector.broadcast %cst_160 : f32 to vector<8x32xf32>
    %362 = arith.addf %360, %361 : vector<8x32xf32>
    %363 = vector.extract_strided_slice %352 {offsets = [0, 64], sizes = [8, 32], strides = [1, 1]} : vector<8x128xf32> to vector<8x32xf32>
    %364 = vector.extract_strided_slice %352 {offsets = [0, 96], sizes = [8, 32], strides = [1, 1]} : vector<8x128xf32> to vector<8x32xf32>
    %cst_161 = arith.constant 5.000000e-01 : f32
    %365 = vector.broadcast %cst_161 : f32 to vector<8x32xf32>
    %366 = arith.mulf %365, %364 : vector<8x32xf32>
    %cst_162 = arith.constant 5.000000e-01 : f32
    %367 = vector.broadcast %cst_162 : f32 to vector<8x32xf32>
    %368 = arith.addf %366, %367 : vector<8x32xf32>
    %369 = arith.mulf %362, %311 : vector<8x32xf32>
    %370 = arith.mulf %357, %363 : vector<8x32xf32>
    %371 = arith.addf %369, %370 : vector<8x32xf32>
    %372 = math.tanh %371 : vector<8x32xf32>
    %373 = arith.mulf %368, %372 : vector<8x32xf32>
    %c2_163 = arith.constant 2 : index
    %c0_164 = arith.constant 0 : index
    %c0_165 = arith.constant 0 : index
    %374 = vector.load %arg6[%c2_163, %c0_164, %c0_165] : memref<8x8x32xf32, #tpu.memory_space<vmem>>, vector<1x8x32xf32>
    %375 = vector.shape_cast %374 : vector<1x8x32xf32> to vector<8x32xf32>
    %376 = vector.shape_cast %373 : vector<8x32xf32> to vector<1x8x32xf32>
    tpu.vector_store %arg6[%c2_163, %c0_164, %c0_165], %376 {strides = array<i32>} : memref<8x8x32xf32, #tpu.memory_space<vmem>>, vector<1x8x32xf32>,
    %c6_166 = arith.constant 6 : index
    %c0_167 = arith.constant 0 : index
    %c0_168 = arith.constant 0 : index
    %377 = vector.load %arg1[%c6_166, %c0_167, %c0_168] : memref<8x8x128xf32, #tpu.memory_space<vmem>>, vector<1x8x128xf32>
    %378 = vector.shape_cast %377 : vector<1x8x128xf32> to vector<8x128xf32>
    %379 = arith.addf %378, %9 : vector<8x128xf32>
    %cst_169 = arith.constant dense<0.000000e+00> : vector<8x128xf32>
    %380 = tpu.matmul %343, %4, %cst_169 {dimension_numbers = #tpu.dot_dimension_numbers<[1], [0], [0], [1], [0, 0, 1, 1], [], []>} : vector<8x32xf32>, vector<32x128xf32>, vector<8x128xf32> -> vector<8x128xf32>
    %381 = arith.addf %379, %380 : vector<8x128xf32>
    %382 = math.tanh %381 : vector<8x128xf32>
    %383 = vector.extract_strided_slice %382 {offsets = [0, 0], sizes = [8, 32], strides = [1, 1]} : vector<8x128xf32> to vector<8x32xf32>
    %cst_170 = arith.constant 5.000000e-01 : f32
    %384 = vector.broadcast %cst_170 : f32 to vector<8x32xf32>
    %385 = arith.mulf %384, %383 : vector<8x32xf32>
    %cst_171 = arith.constant 5.000000e-01 : f32
    %386 = vector.broadcast %cst_171 : f32 to vector<8x32xf32>
    %387 = arith.addf %385, %386 : vector<8x32xf32>
    %388 = vector.extract_strided_slice %382 {offsets = [0, 32], sizes = [8, 32], strides = [1, 1]} : vector<8x128xf32> to vector<8x32xf32>
    %cst_172 = arith.constant 5.000000e-01 : f32
    %389 = vector.broadcast %cst_172 : f32 to vector<8x32xf32>
    %390 = arith.mulf %389, %388 : vector<8x32xf32>
    %cst_173 = arith.constant 5.000000e-01 : f32
    %391 = vector.broadcast %cst_173 : f32 to vector<8x32xf32>
    %392 = arith.addf %390, %391 : vector<8x32xf32>
    %393 = vector.extract_strided_slice %382 {offsets = [0, 64], sizes = [8, 32], strides = [1, 1]} : vector<8x128xf32> to vector<8x32xf32>
    %394 = vector.extract_strided_slice %382 {offsets = [0, 96], sizes = [8, 32], strides = [1, 1]} : vector<8x128xf32> to vector<8x32xf32>
    %cst_174 = arith.constant 5.000000e-01 : f32
    %395 = vector.broadcast %cst_174 : f32 to vector<8x32xf32>
    %396 = arith.mulf %395, %394 : vector<8x32xf32>
    %cst_175 = arith.constant 5.000000e-01 : f32
    %397 = vector.broadcast %cst_175 : f32 to vector<8x32xf32>
    %398 = arith.addf %396, %397 : vector<8x32xf32>
    %399 = arith.mulf %392, %341 : vector<8x32xf32>
    %400 = arith.mulf %387, %393 : vector<8x32xf32>
    %401 = arith.addf %399, %400 : vector<8x32xf32>
    %402 = math.tanh %401 : vector<8x32xf32>
    %403 = arith.mulf %398, %402 : vector<8x32xf32>
    %c6_176 = arith.constant 6 : index
    %c0_177 = arith.constant 0 : index
    %c0_178 = arith.constant 0 : index
    %404 = vector.load %arg5[%c6_176, %c0_177, %c0_178] : memref<8x8x32xf32, #tpu.memory_space<vmem>>, vector<1x8x32xf32>
    %405 = vector.shape_cast %404 : vector<1x8x32xf32> to vector<8x32xf32>
    %406 = vector.shape_cast %403 : vector<8x32xf32> to vector<1x8x32xf32>
    tpu.vector_store %arg5[%c6_176, %c0_177, %c0_178], %406 {strides = array<i32>} : memref<8x8x32xf32, #tpu.memory_space<vmem>>, vector<1x8x32xf32>,
    %c1_179 = arith.constant 1 : index
    %c0_180 = arith.constant 0 : index
    %c0_181 = arith.constant 0 : index
    %407 = vector.load %arg2[%c1_179, %c0_180, %c0_181] : memref<8x8x128xf32, #tpu.memory_space<vmem>>, vector<1x8x128xf32>
    %408 = vector.shape_cast %407 : vector<1x8x128xf32> to vector<8x128xf32>
    %409 = arith.addf %408, %12 : vector<8x128xf32>
    %cst_182 = arith.constant dense<0.000000e+00> : vector<8x128xf32>
    %410 = tpu.matmul %373, %6, %cst_182 {dimension_numbers = #tpu.dot_dimension_numbers<[1], [0], [0], [1], [0, 0, 1, 1], [], []>} : vector<8x32xf32>, vector<32x128xf32>, vector<8x128xf32> -> vector<8x128xf32>
    %411 = arith.addf %409, %410 : vector<8x128xf32>
    %412 = math.tanh %411 : vector<8x128xf32>
    %413 = vector.extract_strided_slice %412 {offsets = [0, 0], sizes = [8, 32], strides = [1, 1]} : vector<8x128xf32> to vector<8x32xf32>
    %cst_183 = arith.constant 5.000000e-01 : f32
    %414 = vector.broadcast %cst_183 : f32 to vector<8x32xf32>
    %415 = arith.mulf %414, %413 : vector<8x32xf32>
    %cst_184 = arith.constant 5.000000e-01 : f32
    %416 = vector.broadcast %cst_184 : f32 to vector<8x32xf32>
    %417 = arith.addf %415, %416 : vector<8x32xf32>
    %418 = vector.extract_strided_slice %412 {offsets = [0, 32], sizes = [8, 32], strides = [1, 1]} : vector<8x128xf32> to vector<8x32xf32>
    %cst_185 = arith.constant 5.000000e-01 : f32
    %419 = vector.broadcast %cst_185 : f32 to vector<8x32xf32>
    %420 = arith.mulf %419, %418 : vector<8x32xf32>
    %cst_186 = arith.constant 5.000000e-01 : f32
    %421 = vector.broadcast %cst_186 : f32 to vector<8x32xf32>
    %422 = arith.addf %420, %421 : vector<8x32xf32>
    %423 = vector.extract_strided_slice %412 {offsets = [0, 64], sizes = [8, 32], strides = [1, 1]} : vector<8x128xf32> to vector<8x32xf32>
    %424 = vector.extract_strided_slice %412 {offsets = [0, 96], sizes = [8, 32], strides = [1, 1]} : vector<8x128xf32> to vector<8x32xf32>
    %cst_187 = arith.constant 5.000000e-01 : f32
    %425 = vector.broadcast %cst_187 : f32 to vector<8x32xf32>
    %426 = arith.mulf %425, %424 : vector<8x32xf32>
    %cst_188 = arith.constant 5.000000e-01 : f32
    %427 = vector.broadcast %cst_188 : f32 to vector<8x32xf32>
    %428 = arith.addf %426, %427 : vector<8x32xf32>
    %429 = arith.mulf %422, %371 : vector<8x32xf32>
    %430 = arith.mulf %417, %423 : vector<8x32xf32>
    %431 = arith.addf %429, %430 : vector<8x32xf32>
    %432 = math.tanh %431 : vector<8x32xf32>
    %433 = arith.mulf %428, %432 : vector<8x32xf32>
    %c1_189 = arith.constant 1 : index
    %c0_190 = arith.constant 0 : index
    %c0_191 = arith.constant 0 : index
    %434 = vector.load %arg6[%c1_189, %c0_190, %c0_191] : memref<8x8x32xf32, #tpu.memory_space<vmem>>, vector<1x8x32xf32>
    %435 = vector.shape_cast %434 : vector<1x8x32xf32> to vector<8x32xf32>
    %436 = vector.shape_cast %433 : vector<8x32xf32> to vector<1x8x32xf32>
    tpu.vector_store %arg6[%c1_189, %c0_190, %c0_191], %436 {strides = array<i32>} : memref<8x8x32xf32, #tpu.memory_space<vmem>>, vector<1x8x32xf32>,
    %c7_192 = arith.constant 7 : index
    %c0_193 = arith.constant 0 : index
    %c0_194 = arith.constant 0 : index
    %437 = vector.load %arg1[%c7_192, %c0_193, %c0_194] : memref<8x8x128xf32, #tpu.memory_space<vmem>>, vector<1x8x128xf32>
    %438 = vector.shape_cast %437 : vector<1x8x128xf32> to vector<8x128xf32>
    %439 = arith.addf %438, %9 : vector<8x128xf32>
    %cst_195 = arith.constant dense<0.000000e+00> : vector<8x128xf32>
    %440 = tpu.matmul %403, %4, %cst_195 {dimension_numbers = #tpu.dot_dimension_numbers<[1], [0], [0], [1], [0, 0, 1, 1], [], []>} : vector<8x32xf32>, vector<32x128xf32>, vector<8x128xf32> -> vector<8x128xf32>
    %441 = arith.addf %439, %440 : vector<8x128xf32>
    %442 = math.tanh %441 : vector<8x128xf32>
    %443 = vector.extract_strided_slice %442 {offsets = [0, 0], sizes = [8, 32], strides = [1, 1]} : vector<8x128xf32> to vector<8x32xf32>
    %cst_196 = arith.constant 5.000000e-01 : f32
    %444 = vector.broadcast %cst_196 : f32 to vector<8x32xf32>
    %445 = arith.mulf %444, %443 : vector<8x32xf32>
    %cst_197 = arith.constant 5.000000e-01 : f32
    %446 = vector.broadcast %cst_197 : f32 to vector<8x32xf32>
    %447 = arith.addf %445, %446 : vector<8x32xf32>
    %448 = vector.extract_strided_slice %442 {offsets = [0, 32], sizes = [8, 32], strides = [1, 1]} : vector<8x128xf32> to vector<8x32xf32>
    %cst_198 = arith.constant 5.000000e-01 : f32
    %449 = vector.broadcast %cst_198 : f32 to vector<8x32xf32>
    %450 = arith.mulf %449, %448 : vector<8x32xf32>
    %cst_199 = arith.constant 5.000000e-01 : f32
    %451 = vector.broadcast %cst_199 : f32 to vector<8x32xf32>
    %452 = arith.addf %450, %451 : vector<8x32xf32>
    %453 = vector.extract_strided_slice %442 {offsets = [0, 64], sizes = [8, 32], strides = [1, 1]} : vector<8x128xf32> to vector<8x32xf32>
    %454 = vector.extract_strided_slice %442 {offsets = [0, 96], sizes = [8, 32], strides = [1, 1]} : vector<8x128xf32> to vector<8x32xf32>
    %cst_200 = arith.constant 5.000000e-01 : f32
    %455 = vector.broadcast %cst_200 : f32 to vector<8x32xf32>
    %456 = arith.mulf %455, %454 : vector<8x32xf32>
    %cst_201 = arith.constant 5.000000e-01 : f32
    %457 = vector.broadcast %cst_201 : f32 to vector<8x32xf32>
    %458 = arith.addf %456, %457 : vector<8x32xf32>
    %459 = arith.mulf %452, %401 : vector<8x32xf32>
    %460 = arith.mulf %447, %453 : vector<8x32xf32>
    %461 = arith.addf %459, %460 : vector<8x32xf32>
    %462 = math.tanh %461 : vector<8x32xf32>
    %463 = arith.mulf %458, %462 : vector<8x32xf32>
    %c7_202 = arith.constant 7 : index
    %c0_203 = arith.constant 0 : index
    %c0_204 = arith.constant 0 : index
    %464 = vector.load %arg5[%c7_202, %c0_203, %c0_204] : memref<8x8x32xf32, #tpu.memory_space<vmem>>, vector<1x8x32xf32>
    %465 = vector.shape_cast %464 : vector<1x8x32xf32> to vector<8x32xf32>
    %466 = vector.shape_cast %463 : vector<8x32xf32> to vector<1x8x32xf32>
    tpu.vector_store %arg5[%c7_202, %c0_203, %c0_204], %466 {strides = array<i32>} : memref<8x8x32xf32, #tpu.memory_space<vmem>>, vector<1x8x32xf32>,
    %c0_205 = arith.constant 0 : index
    %c0_206 = arith.constant 0 : index
    %c0_207 = arith.constant 0 : index
    %467 = vector.load %arg2[%c0_205, %c0_206, %c0_207] : memref<8x8x128xf32, #tpu.memory_space<vmem>>, vector<1x8x128xf32>
    %468 = vector.shape_cast %467 : vector<1x8x128xf32> to vector<8x128xf32>
    %469 = arith.addf %468, %12 : vector<8x128xf32>
    %cst_208 = arith.constant dense<0.000000e+00> : vector<8x128xf32>
    %470 = tpu.matmul %433, %6, %cst_208 {dimension_numbers = #tpu.dot_dimension_numbers<[1], [0], [0], [1], [0, 0, 1, 1], [], []>} : vector<8x32xf32>, vector<32x128xf32>, vector<8x128xf32> -> vector<8x128xf32>
    %471 = arith.addf %469, %470 : vector<8x128xf32>
    %472 = math.tanh %471 : vector<8x128xf32>
    %473 = vector.extract_strided_slice %472 {offsets = [0, 0], sizes = [8, 32], strides = [1, 1]} : vector<8x128xf32> to vector<8x32xf32>
    %cst_209 = arith.constant 5.000000e-01 : f32
    %474 = vector.broadcast %cst_209 : f32 to vector<8x32xf32>
    %475 = arith.mulf %474, %473 : vector<8x32xf32>
    %cst_210 = arith.constant 5.000000e-01 : f32
    %476 = vector.broadcast %cst_210 : f32 to vector<8x32xf32>
    %477 = arith.addf %475, %476 : vector<8x32xf32>
    %478 = vector.extract_strided_slice %472 {offsets = [0, 32], sizes = [8, 32], strides = [1, 1]} : vector<8x128xf32> to vector<8x32xf32>
    %cst_211 = arith.constant 5.000000e-01 : f32
    %479 = vector.broadcast %cst_211 : f32 to vector<8x32xf32>
    %480 = arith.mulf %479, %478 : vector<8x32xf32>
    %cst_212 = arith.constant 5.000000e-01 : f32
    %481 = vector.broadcast %cst_212 : f32 to vector<8x32xf32>
    %482 = arith.addf %480, %481 : vector<8x32xf32>
    %483 = vector.extract_strided_slice %472 {offsets = [0, 64], sizes = [8, 32], strides = [1, 1]} : vector<8x128xf32> to vector<8x32xf32>
    %484 = vector.extract_strided_slice %472 {offsets = [0, 96], sizes = [8, 32], strides = [1, 1]} : vector<8x128xf32> to vector<8x32xf32>
    %cst_213 = arith.constant 5.000000e-01 : f32
    %485 = vector.broadcast %cst_213 : f32 to vector<8x32xf32>
    %486 = arith.mulf %485, %484 : vector<8x32xf32>
    %cst_214 = arith.constant 5.000000e-01 : f32
    %487 = vector.broadcast %cst_214 : f32 to vector<8x32xf32>
    %488 = arith.addf %486, %487 : vector<8x32xf32>
    %489 = arith.mulf %482, %431 : vector<8x32xf32>
    %490 = arith.mulf %477, %483 : vector<8x32xf32>
    %491 = arith.addf %489, %490 : vector<8x32xf32>
    %492 = math.tanh %491 : vector<8x32xf32>
    %493 = arith.mulf %488, %492 : vector<8x32xf32>
    %c0_215 = arith.constant 0 : index
    %c0_216 = arith.constant 0 : index
    %c0_217 = arith.constant 0 : index
    %494 = vector.load %arg6[%c0_215, %c0_216, %c0_217] : memref<8x8x32xf32, #tpu.memory_space<vmem>>, vector<1x8x32xf32>
    %495 = vector.shape_cast %494 : vector<1x8x32xf32> to vector<8x32xf32>
    %496 = vector.shape_cast %493 : vector<8x32xf32> to vector<1x8x32xf32>
    tpu.vector_store %arg6[%c0_215, %c0_216, %c0_217], %496 {strides = array<i32>} : memref<8x8x32xf32, #tpu.memory_space<vmem>>, vector<1x8x32xf32>,
    %c0_218 = arith.constant 0 : index
    %c0_219 = arith.constant 0 : index
    %497 = vector.load %arg8[%c0_218, %c0_219] : memref<8x32xf32, #tpu.memory_space<vmem>>, vector<8x32xf32>
    tpu.vector_store %arg8[%c0_218, %c0_219], %463 {strides = array<i32>} : memref<8x32xf32, #tpu.memory_space<vmem>>, vector<8x32xf32>,
    %c0_220 = arith.constant 0 : index
    %c0_221 = arith.constant 0 : index
    %498 = vector.load %arg9[%c0_220, %c0_221] : memref<8x32xf32, #tpu.memory_space<vmem>>, vector<8x32xf32>
    tpu.vector_store %arg9[%c0_220, %c0_221], %461 {strides = array<i32>} : memref<8x32xf32, #tpu.memory_space<vmem>>, vector<8x32xf32>,
    %c0_222 = arith.constant 0 : index
    %c0_223 = arith.constant 0 : index
    %499 = vector.load %arg10[%c0_222, %c0_223] : memref<8x32xf32, #tpu.memory_space<vmem>>, vector<8x32xf32>
    tpu.vector_store %arg10[%c0_222, %c0_223], %493 {strides = array<i32>} : memref<8x32xf32, #tpu.memory_space<vmem>>, vector<8x32xf32>,
    %c0_224 = arith.constant 0 : index
    %c0_225 = arith.constant 0 : index
    %500 = vector.load %arg11[%c0_224, %c0_225] : memref<8x32xf32, #tpu.memory_space<vmem>>, vector<8x32xf32>
    tpu.vector_store %arg11[%c0_224, %c0_225], %491 {strides = array<i32>} : memref<8x32xf32, #tpu.memory_space<vmem>>, vector<8x32xf32>,
    return
  }
  func.func @transform_0(%arg0: i32) -> (i32, i32, i32) {
    %c0_i32 = arith.constant 0 : i32
    %c0_i32_0 = arith.constant 0 : i32
    %c0_i32_1 = arith.constant 0 : i32
    return %arg0, %c0_i32, %c0_i32_0 : i32, i32, i32
  }
  func.func @transform_1(%arg0: i32) -> (i32, i32, i32) {
    %c0_i32 = arith.constant 0 : i32
    %0 = arith.subi %c0_i32, %arg0 : i32
    %c0_i32_0 = arith.constant 0 : i32
    %c0_i32_1 = arith.constant 0 : i32
    %c0_i32_2 = arith.constant 0 : i32
    return %0, %c0_i32_0, %c0_i32_1 : i32, i32, i32
  }
  func.func @transform_2(%arg0: i32) -> (i32, i32) {
    %c0_i32 = arith.constant 0 : i32
    %c0_i32_0 = arith.constant 0 : i32
    %c0_i32_1 = arith.constant 0 : i32
    return %c0_i32, %c0_i32_0 : i32, i32
  }
  func.func @transform_4(%arg0: i32) -> (i32, i32, i32) {
    %c0_i32 = arith.constant 0 : i32
    %c0_i32_0 = arith.constant 0 : i32
    %c0_i32_1 = arith.constant 0 : i32
    return %arg0, %c0_i32, %c0_i32_0 : i32, i32, i32
  }
  func.func @transform_5(%arg0: i32) -> (i32, i32, i32) {
    %c0_i32 = arith.constant 0 : i32
    %0 = arith.subi %c0_i32, %arg0 : i32
    %c0_i32_0 = arith.constant 0 : i32
    %c0_i32_1 = arith.constant 0 : i32
    %c0_i32_2 = arith.constant 0 : i32
    return %0, %c0_i32_0, %c0_i32_1 : i32, i32, i32
  }
}

</mosaic_0001>

<bundles_post_ra>
// kernel: tpu_custom_call.1
= control target key start
LH: loop header
LB: loop body
LE: loop exit
PB: predicated region body
PF: predicated region fallthrough
CT: control target
= control target key end

     0   :  { %11 = vsyncpa [#allocation8], 0  ;;  %s2717_s0 = inlined_call_operand.hbm [shape: f32[8,8,128], index: 0, kind: input, shape index: {}]   ;;  %s2718_s1 = inlined_call_operand.hbm [shape: f32[8,8,128], index: 1, kind: input, shape index: {}]   ;;  %s2719_s2 = inlined_call_operand.vmem [shape: f32[2,128], index: 2, kind: input, shape index: {}]   ;;  %s2720_s3 = inlined_call_operand.hbm [shape: f32[2,32,128], index: 3, kind: input, shape index: {}]   ;;  %s2721_s4 = inlined_call_operand.hbm [shape: f32[8,8,32], index: 4, kind: output, shape index: {0}]   ;;  %s2722_s5 = inlined_call_operand.hbm [shape: f32[8,8,32], index: 5, kind: output, shape index: {1}]  }
   0x1   :  { %12 = vsyncpa [#allocation11], 0 }
   0x2   :  { %13 = vsyncpa [#allocation9], 0 }
   0x3   :  { %14 = vsyncpa [#allocation14], 0  ;;  %s2362_s18 = smov [#allocation7]   ;;  %s2242_s22 = scalar_lea.hbm %s2717_s0, 1024 }
   0x4   :  { %s20_s19 = sshll.u32 %s2362_s18, 4  ;;  %p2243_p0 = scmp.ne.s32.totalorder %s2717_s0, %s2242_s22  ;;  %s21_s19 = int_to_ptr.vmem [resolvable:$true] %s20_s19 }
   0x5   :  { %p2246_p1 = scmp.lt.u32.totalorder %s2242_s22, %s2717_s0 }
   0x7   :  { %p2248_p2 = pnand %p2246_p1, %p2243_p0 }
   0x9   :  { %2251 = shalt.err (!%p2248_p2)
}
   0xa   :  { %s2252_s27 = scalar_lea.vmem %s21_s19, 1024  ;;  %p2257_p4 = scmp.lt.s32.totalorder %s21_s19, %s21_s19 }
   0xb   :  { %p2253_p3 = scmp.ne.s32.totalorder %s21_s19, %s2252_s27  ;;  %p2258_p5 = scmp.lt.s32.totalorder %s2252_s27, %s2252_s27 }
   0xd   :  { %p2259_p6 = por %p2258_p5, %p2257_p4 }
   0xf   :  { %p2260_p7 = pnand %p2259_p6, %p2253_p3 }
  0x11   :  { %2263 = shalt.err (!%p2260_p7)
}
  0x12   :  { %s2363_s28 = smov 128   ;;  %s2364_s29 = smov 8  }
  0x13   :  { %26 = dma.hbm_to_vmem [thread:$0]  %s2717_s0, 1024, %s21_s19, [#allocation8], %s2363_s28, %s2363_s28, %s2364_s29  }
  0x14   :  { %s2365_s7 = smov [#allocation10]   ;;  %s2264_s11 = scalar_lea.hbm %s2718_s1, 1024 }
  0x15   :  { %s36_s8 = sshll.u32 %s2365_s7, 4  ;;  %p2265_p8 = scmp.ne.s32.totalorder %s2718_s1, %s2264_s11  ;;  %s37_s8 = int_to_ptr.vmem [resolvable:$true] %s36_s8 }
  0x16   :  { %p2268_p9 = scmp.lt.u32.totalorder %s2264_s11, %s2718_s1 }
  0x18   :  { %p2270_p10 = pnand %p2268_p9, %p2265_p8 }
  0x1a   :  { %2273 = shalt.err (!%p2270_p10)
}
  0x1b   :  { %s2274_s16 = scalar_lea.vmem %s37_s8, 1024  ;;  %p2279_p12 = scmp.lt.s32.totalorder %s37_s8, %s37_s8 }
  0x1c   :  { %p2275_p11 = scmp.ne.s32.totalorder %s37_s8, %s2274_s16  ;;  %p2280_p13 = scmp.lt.s32.totalorder %s2274_s16, %s2274_s16 }
  0x1e   :  { %p2281_p0 = por %p2280_p13, %p2279_p12 }
  0x20   :  { %p2282_p1 = pnand %p2281_p0, %p2275_p11 }
  0x22   :  { %2285 = shalt.err (!%p2282_p1)
}
  0x23   :  { %42 = dma.hbm_to_vmem [thread:$0]  %s2718_s1, 1024, %s37_s8, [#allocation11], %s2363_s28, %s2363_s28, %s2364_s29  }
  0x24   :  { %2352 = dma.done.wait [#allocation8], 1024  }
  0x25   :  { %2353 = vsyncadd [#allocation8], 4294966272 }
  0x26   :  { %2354 = dma.done.wait [#allocation11], 1024  }
  0x27   :  { %2355 = vsyncadd [#allocation11], 4294966272 }
  0x28   :  { %s2366_s18 = smov [#allocation2]   ;;  %s2286_s22 = scalar_lea.hbm %s2720_s3, 1024 }
  0x29   :  { %s66_s19 = sshll.u32 %s2366_s18, 4  ;;  %p2287_p2 = scmp.ne.s32.totalorder %s2720_s3, %s2286_s22  ;;  %s67_s19 = int_to_ptr.vmem [resolvable:$true] %s66_s19 }
  0x2a   :  { %p2290_p3 = scmp.lt.u32.totalorder %s2286_s22, %s2720_s3 }
  0x2c   :  { %p2292_p4 = pnand %p2290_p3, %p2287_p2 }
  0x2e   :  { %2295 = shalt.err (!%p2292_p4)  }
  0x2f   :  { %s2296_s1 = scalar_lea.vmem %s67_s19, 1024  ;;  %p2301_p6 = scmp.lt.s32.totalorder %s67_s19, %s67_s19 }
  0x30   :  { %p2297_p5 = scmp.ne.s32.totalorder %s67_s19, %s2296_s1  ;;  %p2302_p7 = scmp.lt.s32.totalorder %s2296_s1, %s2296_s1 }
  0x32   :  { %p2303_p8 = por %p2302_p7, %p2301_p6 }
  0x34   :  { %p2304_p9 = pnand %p2303_p8, %p2297_p5 }
  0x36   :  { %2307 = shalt.err (!%p2304_p9)  }
  0x37   :  { %69 = dma.hbm_to_vmem [thread:$0]  %s2720_s3, 1024, %s67_s19, [#allocation15] }
  0x38   :  { %2356 = dma.done.wait [#allocation15], 1024 }
  0x39   :  { %2357 = vsyncadd [#allocation15], 4294966272  ;;  %v79_v0 = vld [vmem:[#allocation2] sm:$0xff]  ;;  %v80_v1 = vld [vmem:[#allocation2 + $0x8] sm:$0xff]  ;;  %v2367_v3 = vmov 0.0|0.0   ;;  %vm74_vm0 = vcmask 261120  }
  0x3a   :  { %v84_v2 = vld [vmem:[#allocation2 + $0x20] sm:$0xff]  ;;  %2069 = vmatprep.subr.bf16.mxu0 %v2367_v3  ;;  %v2448_v4 = vpack.c.bf16 %v80_v1, %v79_v0  ;;  %2075 = vmatprep.subr.bf16.mxu1 %v2367_v3  ;;  %v85_v5 = vld [vmem:[#allocation2 + $0x28] sm:$0xff]  ;;  %v81_v6 = vld [vmem:[#allocation2 + $0x10] sm:$0xff]  ;;  %vm2368_vm1 = vmmov 0   ;;  %v2369_v9 = vmov 0.0   ;;  %s2370_s3 = smov 32  }
  0x3b   :  { %v82_v7 = vld [vmem:[#allocation2 + $0x18] sm:$0xff]  ;;  %v2451_v8 = vpack.c.bf16 %v85_v5, %v84_v2  ;;  %1901 = vmatprep.mubr.msk.f32.mxu0 %vm2368_vm1, %v2369_v9  ;;  %75 = vst.msk [vmem:[#allocation3] sm:$0xff] %vm74_vm0, %v2369_v9  ;;  %76 = vst.msk [vmem:[#allocation4] sm:$0xff] %vm74_vm0, %v2369_v9  ;;  %v86_v10 = vld [vmem:[#allocation2 + $0x30] sm:$0xff]  ;;  %1912 = vmatprep.mubr.msk.f32.mxu1 %vm2368_vm1, %v2369_v9  ;;  %s2371_s10 = smov 64   ;;  %s2373_s11 = smov [#allocation12]  }
  0x3c   :  { %77 = vst.msk [vmem:[#allocation5] sm:$0xff] %vm74_vm0, %v2369_v9  ;;  %78 = vst.msk [vmem:[#allocation6] sm:$0xff] %vm74_vm0, %v2369_v9  ;;  %v87_v11 = vld [vmem:[#allocation2 + $0x38] sm:$0xff]  ;;  %2071 = vmatpush3.bf16.msra.mxu0 %v2448_v4  ;;  %v2466_v12 = vpack.c.bf16 %v82_v7, %v81_v6  ;;  %v2496_v18 = vld [vmem:[%s2719_s2] ss:$0 sm:$0xff]  ;;  %s1758_s12 = sshll.u32 %s2373_s11, 4  ;;  %s1759_s12 = int_to_ptr.vmem [resolvable:$true] %s1758_s12 }
  0x3d   :  { %2072 = vmatprep.subr.bf16.mxu0 %v2367_v3  ;;  %2077 = vmatpush3.bf16.msra.mxu1 %v2451_v8  ;;  %v2470_v13 = vpack.c.bf16 %v87_v11, %v86_v10  ;;  %v102_v19 = vld [vmem:[#allocation7] sm:$0xff]  ;;  %v209_v21 = vld [vmem:[#allocation10 + $0x38] sm:$0xff]  ;;  %v316_v56 = vld [vmem:[#allocation7 + $0x8] sm:$0xff]  ;;  %s2374_s13 = smov [#allocation13]   ;;  %s2308_s15 = scalar_lea.vmem %s1759_s12, 1024 }
  0x3e   :  { %2078 = vmatprep.subr.bf16.mxu1 %v2367_v3  ;;  %v2501_v20 = vld [vmem:[%s2719_s2 + $0x1] ss:$0 sm:$0xff]  ;;  %v103_v22 = vadd.f32 %v2496_v18, %v102_v19  ;;  %v317_v57 = vadd.f32 %v2496_v18, %v316_v56  ;;  %v418_v58 = vld [vmem:[#allocation10 + $0x30] sm:$0xff]  ;;  %s2372_s2 = smov 96   ;;  %s1774_s14 = sshll.u32 %s2374_s13, 4  ;;  %s1775_s14 = int_to_ptr.vmem [resolvable:$true] %s1774_s14 }
  0x3f   :  { %v210_v23 = vadd.f32 %v2501_v20, %v209_v21  ;;  %v419_v62 = vadd.f32 %v2501_v20, %v418_v58  ;;  %p2309_p10 = scmp.ne.s32.totalorder %s1759_s12, %s2308_s15  ;;  %p2313_p11 = scmp.lt.s32.totalorder %s1759_s12, %s1759_s12 }
  0x40   :  { %2074 = vmatpush3.bf16.msra.mxu0 %v2466_v12  ;;  %p2314_p12 = scmp.lt.s32.totalorder %s2308_s15, %s2308_s15 }
  0x41   :  { %2080 = vmatpush3.bf16.msra.mxu1 %v2470_v13  ;;  %2081 = vmatprep.subr.bf16.mxu0 %v2367_v3 }
  0x42   :  { %v98_v14 = vld [vmem:[#allocation3] sm:$0xff]  ;;  %v99_v16 = vld [vmem:[#allocation4] sm:$0xff]  ;;  %2087 = vmatprep.subr.bf16.mxu1 %v2367_v3  ;;  %p2315_p13 = por %p2314_p12, %p2313_p11 }
  0x43   :  { %v100_v15 = vld [vmem:[#allocation5] sm:$0xff]  ;;  %1902 = vmatmul.mubr.msk.f32.vlgmr.msra.gmra.mrb[0].mxu0 %vm74_vm0, %v98_v14  ;;  %183 = vrot.lane.b32.xlu1 %v99_v16, %s2370_s3  ;;  %v101_v17 = vld [vmem:[#allocation6] sm:$0xff] }
  0x44   :  { %1913 = vmatmul.mubr.msk.f32.vlgmr.msra.gmra.mrb[0].mxu1 %vm74_vm0, %v100_v15  ;;  %2083 = vmatpush3.bf16.msra.mxu0 %v2448_v4  ;;  %p2316_p0 = pnand %p2315_p13, %p2309_p10 }
  0x45   :  { %2084 = vmatprep.subr.bf16.mxu0 %v2367_v3  ;;  %2089 = vmatpush3.bf16.msra.mxu1 %v2451_v8 }
  0x46   :  { %1923 = vmatprep.mubr.msk.f32.mxu0 %vm2368_vm1, %v2369_v9  ;;  %2090 = vmatprep.subr.bf16.mxu1 %v2367_v3 }
  0x47   :  { %289 = vrot.lane.b32.xlu1 %v101_v17, %s2370_s3  ;;  %1934 = vmatprep.mubr.msk.f32.mxu1 %vm2368_vm1, %v2369_v9 }
  0x48   :  { %2086 = vmatpush3.bf16.msra.mxu0 %v2466_v12 }
  0x49   :  { %2092 = vmatpush3.bf16.msra.mxu1 %v2470_v13  ;;  %2093 = vmatprep.subr.bf16.mxu0 %v2367_v3 }
  0x4a   :  { %2099 = vmatprep.subr.bf16.mxu1 %v2367_v3 }
  0xb5   :  { %v184_v40 = vpop.permute.xlu1 %183 }
  0xb9   :  { %v290_v42 = vpop.permute.xlu1 %289 }
 0x116   :  { %v174_v24 = vpop.f32.mrb[0].mxu0 }
 0x117   :  { %v178_v25 = vadd.f32 %v174_v24, %v103_v22  ;;  %v1903_v26 = vpop.f32.mrb[1].mxu0  ;;  %v280_v27 = vpop.f32.mrb[0].mxu1 }
 0x118   :  { %v284_v28 = vadd.f32 %v280_v27, %v210_v23  ;;  %v1914_v29 = vpop.f32.mrb[1].mxu1 }
 0x119   :  { %2178 = vtanh.f32 %v178_v25 }
 0x11a   :  { %2180 = vtanh.f32 %v284_v28 }
 0x123   :  { %v2179_v30 = vpop.eup %2178 }
 0x124   :  { %188 = vrot.lane.b32.xlu0 %v2179_v30, %s2371_s10  ;;  %v2181_v31 = vpop.eup %2180  ;;  %v180_v32 = vmul.f32 0.5, %v2179_v30 }
 0x125   :  { %v286_v34 = vmul.f32 0.5, %v2181_v31 }
 0x126   :  { %v181_v33 = vadd.f32 0.5, %v180_v32 }
 0x127   :  { %v287_v37 = vadd.f32 0.5, %v286_v34  ;;  %v520_v34 = vld [vmem:[#allocation7 + $0x10] sm:$0xff] }
 0x128   :  { %294 = vrot.lane.b32.xlu0 %v2181_v31, %s2371_s10  ;;  %v186_v41 = vmul.f32 %v184_v40, %v181_v33 }
 0x129   :  { %v292_v45 = vmul.f32 %v290_v42, %v287_v37 }
 0x196   :  { %v189_v35 = vpop.permute.xlu0 %188 }
 0x197   :  { %v191_v36 = vmul.f32 %v189_v35, %v181_v33  ;;  %v521_v35 = vadd.f32 %v2496_v18, %v520_v34 }
 0x199   :  { %193 = vrot.lane.b32.xlu0 %v191_v36, %s2370_s3  ;;  %v622_v36 = vld [vmem:[#allocation10 + $0x28] sm:$0xff] }
 0x19a   :  { %v295_v38 = vpop.permute.xlu0 %294  ;;  %v623_v40 = vadd.f32 %v2501_v20, %v622_v36 }
 0x19b   :  { %v297_v39 = vmul.f32 %v295_v38, %v287_v37 }
 0x19d   :  { %299 = vrot.lane.b32.xlu1 %v297_v39, %s2370_s3 }
 0x20b   :  { %v194_v43 = vpop.permute.xlu0 %193 }
 0x20c   :  { %v196_v44 = vadd.f32 %v194_v43, %v186_v41 }
 0x20e   :  { %2182 = vtanh.f32 %v196_v44 }
 0x20f   :  { %v300_v46 = vpop.permute.xlu1 %299 }
 0x210   :  { %v302_v47 = vadd.f32 %v300_v46, %v292_v45 }
 0x212   :  { %2184 = vtanh.f32 %v302_v47 }
 0x218   :  { %v2183_v48 = vpop.eup %2182 }
 0x219   :  { %199 = vrot.lane.b32.xlu0 %v2183_v48, %s2371_s10 }
 0x21c   :  { %v2185_v49 = vpop.eup %2184 }
 0x21d   :  { %305 = vrot.lane.b32.xlu1 %v2185_v49, %s2371_s10 }
 0x28b   :  { %v200_v50 = vpop.permute.xlu0 %199 }
 0x28c   :  { %v202_v51 = vmul.f32 %v200_v50, %v181_v33 }
 0x28e   :  { %204 = vrot.lane.b32.xlu0 %v202_v51, %s2370_s3 }
 0x28f   :  { %v306_v52 = vpop.permute.xlu1 %305 }
 0x290   :  { %v308_v53 = vmul.f32 %v306_v52, %v287_v37 }
 0x292   :  { %310 = vrot.lane.b32.xlu1 %v308_v53, %s2370_s3 }
 0x300   :  { %v205_v54 = vpop.permute.xlu0 %204 }
 0x301   :  { %207 = vst.msk [vmem:[#allocation12] sm:$0xff] %vm74_vm0, %v205_v54  ;;  %1924 = vmatmul.mubr.msk.f32.vlgmr.msra.gmra.mrb[2].mxu0 %vm74_vm0, %v205_v54 }
 0x302   :  { %2095 = vmatpush3.bf16.msra.mxu0 %v2448_v4  ;;  %1945 = vmatprep.mubr.msk.f32.mxu0 %vm2368_vm1, %v2369_v9 }
 0x303   :  { %2096 = vmatprep.subr.bf16.mxu0 %v2367_v3 }
 0x304   :  { %v311_v55 = vpop.permute.xlu1 %310 }
 0x305   :  { %314 = vst.msk [vmem:[#allocation13 + $0x38] sm:$0xff] %vm74_vm0, %v311_v55  ;;  %1935 = vmatmul.mubr.msk.f32.vlgmr.msra.gmra.mrb[2].mxu1 %vm74_vm0, %v311_v55 }
 0x306   :  { %2098 = vmatpush3.bf16.msra.mxu0 %v2466_v12  ;;  %2101 = vmatpush3.bf16.msra.mxu1 %v2451_v8 }
 0x307   :  { %2102 = vmatprep.subr.bf16.mxu1 %v2367_v3  ;;  %1956 = vmatprep.mubr.msk.f32.mxu1 %vm2368_vm1, %v2369_v9 }
 0x308   :  { %2105 = vmatprep.subr.bf16.mxu0 %v2367_v3 }
 0x30a   :  { %2104 = vmatpush3.bf16.msra.mxu1 %v2470_v13 }
 0x30b   :  { %2111 = vmatprep.subr.bf16.mxu1 %v2367_v3 }
 0x3d4   :  { %v386_v59 = vpop.f32.mrb[2].mxu0 }
 0x3d5   :  { %v390_v60 = vadd.f32 %v386_v59, %v317_v57  ;;  %v1925_v61 = vpop.f32.mrb[3].mxu0 }
 0x3d7   :  { %2186 = vtanh.f32 %v390_v60 }
 0x3d8   :  { %v488_v63 = vpop.f32.mrb[2].mxu1 }
 0x3d9   :  { %v492_v0 = vadd.f32 %v488_v63, %v419_v62  ;;  %v1936_v1 = vpop.f32.mrb[3].mxu1 }
 0x3db   :  { %2188 = vtanh.f32 %v492_v0 }
 0x3e1   :  { %v2187_v2 = vpop.eup %2186 }
 0x3e2   :  { %396 = vrot.lane.b32.xlu0 %v2187_v2, %s2371_s10  ;;  %v392_v6 = vmul.f32 0.5, %v2187_v2 }
 0x3e4   :  { %v393_v7 = vadd.f32 0.5, %v392_v6  ;;  %v724_v6 = vld [vmem:[#allocation7 + $0x18] sm:$0xff] }
 0x3e5   :  { %v2189_v5 = vpop.eup %2188 }
 0x3e6   :  { %498 = vrot.lane.b32.xlu1 %v2189_v5, %s2371_s10  ;;  %v494_v10 = vmul.f32 0.5, %v2189_v5  ;;  %v394_v19 = vmul.f32 %v393_v7, %v196_v44 }
 0x3e8   :  { %v495_v15 = vadd.f32 0.5, %v494_v10  ;;  %v826_v10 = vld [vmem:[#allocation10 + $0x20] sm:$0xff] }
 0x3ea   :  { %v496_v23 = vmul.f32 %v495_v15, %v302_v47 }
 0x454   :  { %v397_v11 = vpop.permute.xlu0 %396 }
 0x455   :  { %v399_v14 = vmul.f32 %v397_v11, %v393_v7 }
 0x457   :  { %401 = vrot.lane.b32.xlu0 %v399_v14, %s2370_s3 }
 0x458   :  { %v499_v16 = vpop.permute.xlu1 %498 }
 0x459   :  { %v501_v17 = vmul.f32 %v499_v16, %v495_v15  ;;  %v827_v16 = vadd.f32 %v2501_v20, %v826_v10 }
 0x45b   :  { %503 = vrot.lane.b32.xlu1 %v501_v17, %s2370_s3 }
 0x4c9   :  { %v402_v21 = vpop.permute.xlu0 %401 }
 0x4ca   :  { %v404_v22 = vadd.f32 %v402_v21, %v394_v19 }
 0x4cc   :  { %2190 = vtanh.f32 %v404_v22 }
 0x4cd   :  { %v504_v24 = vpop.permute.xlu1 %503 }
 0x4ce   :  { %v506_v25 = vadd.f32 %v504_v24, %v496_v23 }
 0x4d0   :  { %2192 = vtanh.f32 %v506_v25 }
 0x4d6   :  { %v2191_v26 = vpop.eup %2190 }
 0x4d7   :  { %407 = vrot.lane.b32.xlu0 %v2191_v26, %s2371_s10 }
 0x4da   :  { %v2193_v27 = vpop.eup %2192 }
 0x4db   :  { %509 = vrot.lane.b32.xlu1 %v2193_v27, %s2371_s10 }
 0x549   :  { %v408_v28 = vpop.permute.xlu0 %407 }
 0x54a   :  { %v410_v29 = vmul.f32 %v408_v28, %v393_v7  ;;  %v725_v7 = vadd.f32 %v2496_v18, %v724_v6 }
 0x54c   :  { %412 = vrot.lane.b32.xlu0 %v410_v29, %s2370_s3 }
 0x54d   :  { %v510_v30 = vpop.permute.xlu1 %509 }
 0x54e   :  { %v512_v31 = vmul.f32 %v510_v30, %v495_v15 }
 0x550   :  { %514 = vrot.lane.b32.xlu1 %v512_v31, %s2370_s3 }
 0x5be   :  { %v413_v32 = vpop.permute.xlu0 %412 }
 0x5bf   :  { %416 = vst.msk [vmem:[#allocation12 + $0x8] sm:$0xff] %vm74_vm0, %v413_v32  ;;  %1946 = vmatmul.mubr.msk.f32.vlgmr.msra.gmra.mrb[4].mxu0 %vm74_vm0, %v413_v32 }
 0x5c0   :  { %2107 = vmatpush3.bf16.msra.mxu0 %v2448_v4  ;;  %1967 = vmatprep.mubr.msk.f32.mxu0 %vm2368_vm1, %v2369_v9 }
 0x5c1   :  { %2108 = vmatprep.subr.bf16.mxu0 %v2367_v3 }
 0x5c2   :  { %v515_v33 = vpop.permute.xlu1 %514 }
 0x5c3   :  { %518 = vst.msk [vmem:[#allocation13 + $0x30] sm:$0xff] %vm74_vm0, %v515_v33  ;;  %1957 = vmatmul.mubr.msk.f32.vlgmr.msra.gmra.mrb[4].mxu1 %vm74_vm0, %v515_v33 }
 0x5c4   :  { %2110 = vmatpush3.bf16.msra.mxu0 %v2466_v12  ;;  %2113 = vmatpush3.bf16.msra.mxu1 %v2451_v8 }
 0x5c5   :  { %2114 = vmatprep.subr.bf16.mxu1 %v2367_v3  ;;  %1978 = vmatprep.mubr.msk.f32.mxu1 %vm2368_vm1, %v2369_v9 }
 0x5c6   :  { %2117 = vmatprep.subr.bf16.mxu0 %v2367_v3 }
 0x5c8   :  { %2116 = vmatpush3.bf16.msra.mxu1 %v2470_v13 }
 0x5c9   :  { %2123 = vmatprep.subr.bf16.mxu1 %v2367_v3 }
 0x692   :  { %v590_v37 = vpop.f32.mrb[4].mxu0 }
 0x693   :  { %v594_v38 = vadd.f32 %v590_v37, %v521_v35  ;;  %v1947_v39 = vpop.f32.mrb[5].mxu0 }
 0x695   :  { %2194 = vtanh.f32 %v594_v38 }
 0x696   :  { %v692_v41 = vpop.f32.mrb[4].mxu1 }
 0x697   :  { %v696_v42 = vadd.f32 %v692_v41, %v623_v40  ;;  %v1958_v43 = vpop.f32.mrb[5].mxu1 }
 0x699   :  { %2196 = vtanh.f32 %v696_v42 }
 0x69f   :  { %v2195_v44 = vpop.eup %2194 }
 0x6a0   :  { %600 = vrot.lane.b32.xlu0 %v2195_v44, %s2371_s10  ;;  %v596_v46 = vmul.f32 0.5, %v2195_v44 }
 0x6a2   :  { %v597_v47 = vadd.f32 0.5, %v596_v46  ;;  %v928_v46 = vld [vmem:[#allocation7 + $0x20] sm:$0xff] }
 0x6a3   :  { %v2197_v45 = vpop.eup %2196 }
 0x6a4   :  { %702 = vrot.lane.b32.xlu1 %v2197_v45, %s2371_s10  ;;  %v698_v48 = vmul.f32 0.5, %v2197_v45  ;;  %v598_v54 = vmul.f32 %v597_v47, %v404_v22 }
 0x6a6   :  { %v699_v51 = vadd.f32 0.5, %v698_v48  ;;  %v1030_v48 = vld [vmem:[#allocation10 + $0x18] sm:$0xff] }
 0x6a8   :  { %v700_v57 = vmul.f32 %v699_v51, %v506_v25 }
 0x712   :  { %v601_v49 = vpop.permute.xlu0 %600 }
 0x713   :  { %v603_v50 = vmul.f32 %v601_v49, %v597_v47 }
 0x715   :  { %605 = vrot.lane.b32.xlu0 %v603_v50, %s2370_s3 }
 0x716   :  { %v703_v52 = vpop.permute.xlu1 %702 }
 0x717   :  { %v705_v53 = vmul.f32 %v703_v52, %v699_v51  ;;  %v1031_v52 = vadd.f32 %v2501_v20, %v1030_v48 }
 0x719   :  { %707 = vrot.lane.b32.xlu1 %v705_v53, %s2370_s3 }
 0x787   :  { %v606_v55 = vpop.permute.xlu0 %605 }
 0x788   :  { %v608_v56 = vadd.f32 %v606_v55, %v598_v54 }
 0x78a   :  { %2198 = vtanh.f32 %v608_v56 }
 0x78b   :  { %v708_v58 = vpop.permute.xlu1 %707 }
 0x78c   :  { %v710_v59 = vadd.f32 %v708_v58, %v700_v57 }
 0x78e   :  { %2200 = vtanh.f32 %v710_v59 }
 0x794   :  { %v2199_v60 = vpop.eup %2198 }
 0x795   :  { %611 = vrot.lane.b32.xlu0 %v2199_v60, %s2371_s10 }
 0x798   :  { %v2201_v61 = vpop.eup %2200 }
 0x799   :  { %713 = vrot.lane.b32.xlu1 %v2201_v61, %s2371_s10 }
 0x807   :  { %v612_v62 = vpop.permute.xlu0 %611 }
 0x808   :  { %v614_v63 = vmul.f32 %v612_v62, %v597_v47  ;;  %v929_v47 = vadd.f32 %v2496_v18, %v928_v46 }
 0x80a   :  { %616 = vrot.lane.b32.xlu0 %v614_v63, %s2370_s3 }
 0x80b   :  { %v714_v0 = vpop.permute.xlu1 %713 }
 0x80c   :  { %v716_v1 = vmul.f32 %v714_v0, %v699_v51 }
 0x80e   :  { %718 = vrot.lane.b32.xlu1 %v716_v1, %s2370_s3 }
 0x87c   :  { %v617_v2 = vpop.permute.xlu0 %616 }
 0x87d   :  { %620 = vst.msk [vmem:[#allocation12 + $0x10] sm:$0xff] %vm74_vm0, %v617_v2  ;;  %1968 = vmatmul.mubr.msk.f32.vlgmr.msra.gmra.mrb[6].mxu0 %vm74_vm0, %v617_v2 }
 0x87e   :  { %2119 = vmatpush3.bf16.msra.mxu0 %v2448_v4  ;;  %1989 = vmatprep.mubr.msk.f32.mxu0 %vm2368_vm1, %v2369_v9 }
 0x87f   :  { %2120 = vmatprep.subr.bf16.mxu0 %v2367_v3 }
 0x880   :  { %v719_v5 = vpop.permute.xlu1 %718 }
 0x881   :  { %722 = vst.msk [vmem:[#allocation13 + $0x28] sm:$0xff] %vm74_vm0, %v719_v5  ;;  %1979 = vmatmul.mubr.msk.f32.vlgmr.msra.gmra.mrb[6].mxu1 %vm74_vm0, %v719_v5 }
 0x882   :  { %2122 = vmatpush3.bf16.msra.mxu0 %v2466_v12  ;;  %2125 = vmatpush3.bf16.msra.mxu1 %v2451_v8 }
 0x883   :  { %2126 = vmatprep.subr.bf16.mxu1 %v2367_v3  ;;  %2000 = vmatprep.mubr.msk.f32.mxu1 %vm2368_vm1, %v2369_v9 }
 0x884   :  { %2129 = vmatprep.subr.bf16.mxu0 %v2367_v3 }
 0x886   :  { %2128 = vmatpush3.bf16.msra.mxu1 %v2470_v13 }
 0x887   :  { %2135 = vmatprep.subr.bf16.mxu1 %v2367_v3 }
 0x950   :  { %v794_v11 = vpop.f32.mrb[6].mxu0 }
 0x951   :  { %v798_v14 = vadd.f32 %v794_v11, %v725_v7  ;;  %v1969_v15 = vpop.f32.mrb[7].mxu0 }
 0x953   :  { %2202 = vtanh.f32 %v798_v14 }
 0x954   :  { %v896_v17 = vpop.f32.mrb[6].mxu1 }
 0x955   :  { %v900_v19 = vadd.f32 %v896_v17, %v827_v16  ;;  %v1980_v21 = vpop.f32.mrb[7].mxu1 }
 0x957   :  { %2204 = vtanh.f32 %v900_v19 }
 0x95d   :  { %v2203_v22 = vpop.eup %2202 }
 0x95e   :  { %804 = vrot.lane.b32.xlu0 %v2203_v22, %s2371_s10  ;;  %v800_v24 = vmul.f32 0.5, %v2203_v22 }
 0x960   :  { %v801_v25 = vadd.f32 0.5, %v800_v24  ;;  %v1132_v24 = vld [vmem:[#allocation7 + $0x28] sm:$0xff] }
 0x961   :  { %v2205_v23 = vpop.eup %2204 }
 0x962   :  { %906 = vrot.lane.b32.xlu1 %v2205_v23, %s2371_s10  ;;  %v902_v26 = vmul.f32 0.5, %v2205_v23  ;;  %v802_v32 = vmul.f32 %v801_v25, %v608_v56 }
 0x964   :  { %v903_v29 = vadd.f32 0.5, %v902_v26  ;;  %v1234_v26 = vld [vmem:[#allocation10 + $0x10] sm:$0xff] }
 0x966   :  { %v904_v35 = vmul.f32 %v903_v29, %v710_v59 }
 0x9d0   :  { %v805_v27 = vpop.permute.xlu0 %804 }
 0x9d1   :  { %v807_v28 = vmul.f32 %v805_v27, %v801_v25 }
 0x9d3   :  { %809 = vrot.lane.b32.xlu0 %v807_v28, %s2370_s3 }
 0x9d4   :  { %v907_v30 = vpop.permute.xlu1 %906 }
 0x9d5   :  { %v909_v31 = vmul.f32 %v907_v30, %v903_v29  ;;  %v1235_v30 = vadd.f32 %v2501_v20, %v1234_v26 }
 0x9d7   :  { %911 = vrot.lane.b32.xlu1 %v909_v31, %s2370_s3 }
 0xa45   :  { %v810_v33 = vpop.permute.xlu0 %809 }
 0xa46   :  { %v812_v34 = vadd.f32 %v810_v33, %v802_v32 }
 0xa48   :  { %2206 = vtanh.f32 %v812_v34 }
 0xa49   :  { %v912_v36 = vpop.permute.xlu1 %911 }
 0xa4a   :  { %v914_v37 = vadd.f32 %v912_v36, %v904_v35 }
 0xa4c   :  { %2208 = vtanh.f32 %v914_v37 }
 0xa52   :  { %v2207_v38 = vpop.eup %2206 }
 0xa53   :  { %815 = vrot.lane.b32.xlu0 %v2207_v38, %s2371_s10 }
 0xa56   :  { %v2209_v39 = vpop.eup %2208 }
 0xa57   :  { %917 = vrot.lane.b32.xlu1 %v2209_v39, %s2371_s10 }
 0xac5   :  { %v816_v40 = vpop.permute.xlu0 %815 }
 0xac6   :  { %v818_v41 = vmul.f32 %v816_v40, %v801_v25  ;;  %v1133_v25 = vadd.f32 %v2496_v18, %v1132_v24 }
 0xac8   :  { %820 = vrot.lane.b32.xlu0 %v818_v41, %s2370_s3 }
 0xac9   :  { %v918_v42 = vpop.permute.xlu1 %917 }
 0xaca   :  { %v920_v43 = vmul.f32 %v918_v42, %v903_v29 }
 0xacc   :  { %922 = vrot.lane.b32.xlu1 %v920_v43, %s2370_s3 }
 0xb3a   :  { %v821_v44 = vpop.permute.xlu0 %820 }
 0xb3b   :  { %824 = vst.msk [vmem:[#allocation12 + $0x18] sm:$0xff] %vm74_vm0, %v821_v44  ;;  %1990 = vmatmul.mubr.msk.f32.vlgmr.msra.gmra.mrb[8].mxu0 %vm74_vm0, %v821_v44 }
 0xb3c   :  { %2131 = vmatpush3.bf16.msra.mxu0 %v2448_v4  ;;  %2011 = vmatprep.mubr.msk.f32.mxu0 %vm2368_vm1, %v2369_v9 }
 0xb3d   :  { %2132 = vmatprep.subr.bf16.mxu0 %v2367_v3 }
 0xb3e   :  { %v923_v45 = vpop.permute.xlu1 %922 }
 0xb3f   :  { %926 = vst.msk [vmem:[#allocation13 + $0x20] sm:$0xff] %vm74_vm0, %v923_v45  ;;  %2001 = vmatmul.mubr.msk.f32.vlgmr.msra.gmra.mrb[8].mxu1 %vm74_vm0, %v923_v45 }
 0xb40   :  { %2134 = vmatpush3.bf16.msra.mxu0 %v2466_v12  ;;  %2137 = vmatpush3.bf16.msra.mxu1 %v2451_v8 }
 0xb41   :  { %2138 = vmatprep.subr.bf16.mxu1 %v2367_v3  ;;  %2022 = vmatprep.mubr.msk.f32.mxu1 %vm2368_vm1, %v2369_v9 }
 0xb42   :  { %2141 = vmatprep.subr.bf16.mxu0 %v2367_v3 }
 0xb44   :  { %2140 = vmatpush3.bf16.msra.mxu1 %v2470_v13 }
 0xb45   :  { %2147 = vmatprep.subr.bf16.mxu1 %v2367_v3 }
 0xc0e   :  { %v998_v49 = vpop.f32.mrb[8].mxu0 }
 0xc0f   :  { %v1002_v50 = vadd.f32 %v998_v49, %v929_v47  ;;  %v1991_v51 = vpop.f32.mrb[9].mxu0 }
 0xc11   :  { %2210 = vtanh.f32 %v1002_v50 }
 0xc12   :  { %v1100_v53 = vpop.f32.mrb[8].mxu1 }
 0xc13   :  { %v1104_v54 = vadd.f32 %v1100_v53, %v1031_v52  ;;  %v2002_v55 = vpop.f32.mrb[9].mxu1 }
 0xc15   :  { %2212 = vtanh.f32 %v1104_v54 }
 0xc1b   :  { %v2211_v56 = vpop.eup %2210 }
 0xc1c   :  { %1008 = vrot.lane.b32.xlu0 %v2211_v56, %s2371_s10  ;;  %v1004_v58 = vmul.f32 0.5, %v2211_v56 }
 0xc1e   :  { %v1005_v59 = vadd.f32 0.5, %v1004_v58 }
 0xc1f   :  { %v2213_v57 = vpop.eup %2212 }
 0xc20   :  { %1110 = vrot.lane.b32.xlu1 %v2213_v57, %s2371_s10  ;;  %v1106_v60 = vmul.f32 0.5, %v2213_v57  ;;  %v1006_v2 = vmul.f32 %v1005_v59, %v812_v34 }
 0xc22   :  { %v1107_v63 = vadd.f32 0.5, %v1106_v60 }
 0xc24   :  { %v1108_v7 = vmul.f32 %v1107_v63, %v914_v37 }
 0xc8e   :  { %v1009_v61 = vpop.permute.xlu0 %1008 }
 0xc8f   :  { %v1011_v62 = vmul.f32 %v1009_v61, %v1005_v59 }
 0xc91   :  { %1013 = vrot.lane.b32.xlu0 %v1011_v62, %s2370_s3 }
 0xc92   :  { %v1111_v0 = vpop.permute.xlu1 %1110 }
 0xc93   :  { %v1113_v1 = vmul.f32 %v1111_v0, %v1107_v63 }
 0xc95   :  { %1115 = vrot.lane.b32.xlu1 %v1113_v1, %s2370_s3 }
 0xd03   :  { %v1014_v5 = vpop.permute.xlu0 %1013 }
 0xd04   :  { %v1016_v6 = vadd.f32 %v1014_v5, %v1006_v2 }
 0xd06   :  { %2214 = vtanh.f32 %v1016_v6 }
 0xd07   :  { %v1116_v10 = vpop.permute.xlu1 %1115 }
 0xd08   :  { %v1118_v11 = vadd.f32 %v1116_v10, %v1108_v7 }
 0xd0a   :  { %2216 = vtanh.f32 %v1118_v11 }
 0xd10   :  { %v2215_v14 = vpop.eup %2214 }
 0xd11   :  { %1019 = vrot.lane.b32.xlu0 %v2215_v14, %s2371_s10 }
 0xd14   :  { %v2217_v15 = vpop.eup %2216 }
 0xd15   :  { %1121 = vrot.lane.b32.xlu1 %v2217_v15, %s2371_s10 }
 0xd83   :  { %v1020_v16 = vpop.permute.xlu0 %1019 }
 0xd84   :  { %v1022_v17 = vmul.f32 %v1020_v16, %v1005_v59  ;;  %v1438_v59 = vld [vmem:[#allocation10 + $0x8] sm:$0xff] }
 0xd86   :  { %1024 = vrot.lane.b32.xlu0 %v1022_v17, %s2370_s3 }
 0xd87   :  { %v1122_v19 = vpop.permute.xlu1 %1121 }
 0xd88   :  { %v1124_v21 = vmul.f32 %v1122_v19, %v1107_v63  ;;  %v1439_v63 = vadd.f32 %v2501_v20, %v1438_v59 }
 0xd8a   :  { %1126 = vrot.lane.b32.xlu1 %v1124_v21, %s2370_s3 }
 0xdf8   :  { %v1025_v22 = vpop.permute.xlu0 %1024 }
 0xdf9   :  { %1028 = vst.msk [vmem:[#allocation12 + $0x20] sm:$0xff] %vm74_vm0, %v1025_v22  ;;  %2012 = vmatmul.mubr.msk.f32.vlgmr.msra.gmra.mrb[10].mxu0 %vm74_vm0, %v1025_v22 }
 0xdfa   :  { %2143 = vmatpush3.bf16.msra.mxu0 %v2448_v4  ;;  %2033 = vmatprep.mubr.msk.f32.mxu0 %vm2368_vm1, %v2369_v9 }
 0xdfb   :  { %2144 = vmatprep.subr.bf16.mxu0 %v2367_v3 }
 0xdfc   :  { %v1127_v23 = vpop.permute.xlu1 %1126 }
 0xdfd   :  { %1130 = vst.msk [vmem:[#allocation13 + $0x18] sm:$0xff] %vm74_vm0, %v1127_v23  ;;  %2023 = vmatmul.mubr.msk.f32.vlgmr.msra.gmra.mrb[10].mxu1 %vm74_vm0, %v1127_v23 }
 0xdfe   :  { %2146 = vmatpush3.bf16.msra.mxu0 %v2466_v12  ;;  %2149 = vmatpush3.bf16.msra.mxu1 %v2451_v8 }
 0xdff   :  { %2150 = vmatprep.subr.bf16.mxu1 %v2367_v3  ;;  %2044 = vmatprep.mubr.msk.f32.mxu1 %vm2368_vm1, %v2369_v9 }
 0xe00   :  { %2153 = vmatprep.subr.bf16.mxu0 %v2367_v3 }
 0xe02   :  { %2152 = vmatpush3.bf16.msra.mxu1 %v2470_v13 }
 0xe03   :  { %2159 = vmatprep.subr.bf16.mxu1 %v2367_v3 }
 0xecc   :  { %v1202_v27 = vpop.f32.mrb[10].mxu0 }
 0xecd   :  { %v1206_v28 = vadd.f32 %v1202_v27, %v1133_v25  ;;  %v2013_v29 = vpop.f32.mrb[11].mxu0 }
 0xecf   :  { %2218 = vtanh.f32 %v1206_v28 }
 0xed0   :  { %v1304_v31 = vpop.f32.mrb[10].mxu1 }
 0xed1   :  { %v1308_v32 = vadd.f32 %v1304_v31, %v1235_v30  ;;  %v2024_v33 = vpop.f32.mrb[11].mxu1  ;;  %v1540_v30 = vld [vmem:[#allocation7 + $0x38] sm:$0xff] }
 0xed2   :  { %v1541_v31 = vadd.f32 %v2496_v18, %v1540_v30 }
 0xed3   :  { %2220 = vtanh.f32 %v1308_v32  ;;  %v1641_v32 = vld [vmem:[#allocation10] sm:$0xff] }
 0xed9   :  { %v2219_v34 = vpop.eup %2218 }
 0xeda   :  { %1212 = vrot.lane.b32.xlu0 %v2219_v34, %s2371_s10  ;;  %v1208_v36 = vmul.f32 0.5, %v2219_v34 }
 0xedc   :  { %v1209_v37 = vadd.f32 0.5, %v1208_v36  ;;  %v1642_v36 = vadd.f32 %v2501_v20, %v1641_v32 }
 0xedd   :  { %v2221_v35 = vpop.eup %2220 }
 0xede   :  { %1314 = vrot.lane.b32.xlu1 %v2221_v35, %s2371_s10  ;;  %v1310_v38 = vmul.f32 0.5, %v2221_v35  ;;  %v1210_v44 = vmul.f32 %v1209_v37, %v1016_v6 }
 0xee0   :  { %v1311_v41 = vadd.f32 0.5, %v1310_v38 }
 0xee2   :  { %v1312_v47 = vmul.f32 %v1311_v41, %v1118_v11 }
 0xf4c   :  { %v1213_v39 = vpop.permute.xlu0 %1212 }
 0xf4d   :  { %v1215_v40 = vmul.f32 %v1213_v39, %v1209_v37 }
 0xf4f   :  { %1217 = vrot.lane.b32.xlu0 %v1215_v40, %s2370_s3 }
 0xf50   :  { %v1315_v42 = vpop.permute.xlu1 %1314 }
 0xf51   :  { %v1317_v43 = vmul.f32 %v1315_v42, %v1311_v41 }
 0xf53   :  { %1319 = vrot.lane.b32.xlu1 %v1317_v43, %s2370_s3 }
 0xfc1   :  { %v1218_v45 = vpop.permute.xlu0 %1217 }
 0xfc2   :  { %v1220_v46 = vadd.f32 %v1218_v45, %v1210_v44 }
 0xfc4   :  { %2222 = vtanh.f32 %v1220_v46 }
 0xfc5   :  { %v1320_v48 = vpop.permute.xlu1 %1319 }
 0xfc6   :  { %v1322_v49 = vadd.f32 %v1320_v48, %v1312_v47 }
 0xfc8   :  { %2224 = vtanh.f32 %v1322_v49 }
 0xfce   :  { %v2223_v50 = vpop.eup %2222 }
 0xfcf   :  { %1223 = vrot.lane.b32.xlu0 %v2223_v50, %s2371_s10 }
 0xfd2   :  { %v2225_v51 = vpop.eup %2224 }
 0xfd3   :  { %1325 = vrot.lane.b32.xlu1 %v2225_v51, %s2371_s10 }
0x1041   :  { %v1224_v52 = vpop.permute.xlu0 %1223 }
0x1042   :  { %v1226_v53 = vmul.f32 %v1224_v52, %v1209_v37 }
0x1044   :  { %1228 = vrot.lane.b32.xlu0 %v1226_v53, %s2370_s3 }
0x1045   :  { %v1326_v54 = vpop.permute.xlu1 %1325 }
0x1046   :  { %v1328_v55 = vmul.f32 %v1326_v54, %v1311_v41 }
0x1048   :  { %1330 = vrot.lane.b32.xlu1 %v1328_v55, %s2370_s3 }
0x10b6   :  { %v1229_v56 = vpop.permute.xlu0 %1228 }
0x10b7   :  { %1232 = vst.msk [vmem:[#allocation12 + $0x28] sm:$0xff] %vm74_vm0, %v1229_v56  ;;  %2034 = vmatmul.mubr.msk.f32.vlgmr.msra.gmra.mrb[12].mxu0 %vm74_vm0, %v1229_v56 }
0x10b8   :  { %2155 = vmatpush3.bf16.msra.mxu0 %v2448_v4  ;;  %2055 = vmatprep.mubr.msk.f32.mxu0 %vm2368_vm1, %v2369_v9  ;;  %v1336_v4 = vld [vmem:[#allocation7 + $0x30] sm:$0xff] }
0x10b9   :  { %2156 = vmatprep.subr.bf16.mxu0 %v2367_v3  ;;  %v1337_v58 = vadd.f32 %v2496_v18, %v1336_v4 }
0x10ba   :  { %v1331_v57 = vpop.permute.xlu1 %1330 }
0x10bb   :  { %1334 = vst.msk [vmem:[#allocation13 + $0x10] sm:$0xff] %vm74_vm0, %v1331_v57  ;;  %2045 = vmatmul.mubr.msk.f32.vlgmr.msra.gmra.mrb[12].mxu1 %vm74_vm0, %v1331_v57 }
0x10bc   :  { %2158 = vmatpush3.bf16.msra.mxu0 %v2466_v12  ;;  %2161 = vmatpush3.bf16.msra.mxu1 %v2451_v8 }
0x10bd   :  { %2162 = vmatprep.subr.bf16.mxu1 %v2367_v3  ;;  %2066 = vmatprep.mubr.msk.f32.mxu1 %vm2368_vm1, %v2369_v9 }
0x10c0   :  { %2164 = vmatpush3.bf16.msra.mxu1 %v2470_v13 }
0x118a   :  { %v1406_v60 = vpop.f32.mrb[12].mxu0 }
0x118b   :  { %v1410_v61 = vadd.f32 %v1406_v60, %v1337_v58  ;;  %v2035_v62 = vpop.f32.mrb[13].mxu0 }
0x118d   :  { %2226 = vtanh.f32 %v1410_v61 }
0x118e   :  { %v1508_v12 = vpop.f32.mrb[12].mxu1 }
0x118f   :  { %v1512_v0 = vadd.f32 %v1508_v12, %v1439_v63  ;;  %v2046_v8 = vpop.f32.mrb[13].mxu1 }
0x1191   :  { %2228 = vtanh.f32 %v1512_v0 }
0x1197   :  { %v2227_v3 = vpop.eup %2226 }
0x1198   :  { %1416 = vrot.lane.b32.xlu0 %v2227_v3, %s2371_s10  ;;  %v1412_v13 = vmul.f32 0.5, %v2227_v3 }
0x119a   :  { %v1413_v1 = vadd.f32 0.5, %v1412_v13 }
0x119b   :  { %v2229_v9 = vpop.eup %2228 }
0x119c   :  { %1518 = vrot.lane.b32.xlu1 %v2229_v9, %s2371_s10  ;;  %v1514_v2 = vmul.f32 0.5, %v2229_v9  ;;  %v1414_v14 = vmul.f32 %v1413_v1, %v1220_v46 }
0x119e   :  { %v1515_v7 = vadd.f32 0.5, %v1514_v2 }
0x11a0   :  { %v1516_v17 = vmul.f32 %v1515_v7, %v1322_v49 }
0x120a   :  { %v1417_v5 = vpop.permute.xlu0 %1416 }
0x120b   :  { %v1419_v6 = vmul.f32 %v1417_v5, %v1413_v1 }
0x120d   :  { %1421 = vrot.lane.b32.xlu0 %v1419_v6, %s2370_s3 }
0x120e   :  { %v1519_v10 = vpop.permute.xlu1 %1518 }
0x120f   :  { %v1521_v11 = vmul.f32 %v1519_v10, %v1515_v7 }
0x1211   :  { %1523 = vrot.lane.b32.xlu1 %v1521_v11, %s2370_s3 }
0x127f   :  { %v1422_v15 = vpop.permute.xlu0 %1421 }
0x1280   :  { %v1424_v16 = vadd.f32 %v1422_v15, %v1414_v14 }
0x1282   :  { %2230 = vtanh.f32 %v1424_v16 }
0x1283   :  { %v1524_v19 = vpop.permute.xlu1 %1523 }
0x1284   :  { %v1526_v21 = vadd.f32 %v1524_v19, %v1516_v17 }
0x1286   :  { %2232 = vtanh.f32 %v1526_v21 }
0x128c   :  { %v2231_v22 = vpop.eup %2230 }
0x128d   :  { %1427 = vrot.lane.b32.xlu0 %v2231_v22, %s2371_s10 }
0x1290   :  { %v2233_v23 = vpop.eup %2232 }
0x1291   :  { %1529 = vrot.lane.b32.xlu1 %v2233_v23, %s2371_s10 }
0x12ff   :  { %v1428_v24 = vpop.permute.xlu0 %1427 }
0x1300   :  { %v1430_v25 = vmul.f32 %v1428_v24, %v1413_v1 }
0x1302   :  { %1432 = vrot.lane.b32.xlu0 %v1430_v25, %s2370_s3 }
0x1303   :  { %v1530_v26 = vpop.permute.xlu1 %1529 }
0x1304   :  { %v1532_v27 = vmul.f32 %v1530_v26, %v1515_v7 }
0x1306   :  { %1534 = vrot.lane.b32.xlu1 %v1532_v27, %s2370_s3 }
0x1374   :  { %v1433_v28 = vpop.permute.xlu0 %1432 }
0x1375   :  { %1436 = vst.msk [vmem:[#allocation12 + $0x30] sm:$0xff] %vm74_vm0, %v1433_v28  ;;  %2056 = vmatmul.mubr.msk.f32.vlgmr.msra.gmra.mrb[14].mxu0 %vm74_vm0, %v1433_v28 }
0x1378   :  { %v1535_v29 = vpop.permute.xlu1 %1534 }
0x1379   :  { %1538 = vst.msk [vmem:[#allocation13 + $0x8] sm:$0xff] %vm74_vm0, %v1535_v29  ;;  %2067 = vmatmul.mubr.msk.f32.vlgmr.msra.gmra.mrb[14].mxu1 %vm74_vm0, %v1535_v29 }
0x1448   :  { %v1610_v33 = vpop.f32.mrb[14].mxu0 }
0x1449   :  { %v1614_v34 = vadd.f32 %v1610_v33, %v1541_v31  ;;  %v2057_v35 = vpop.f32.mrb[15].mxu0 }
0x144b   :  { %2234 = vtanh.f32 %v1614_v34 }
0x144c   :  { %v1711_v37 = vpop.f32.mrb[14].mxu1 }
0x144d   :  { %v1715_v38 = vadd.f32 %v1711_v37, %v1642_v36  ;;  %v2068_v39 = vpop.f32.mrb[15].mxu1 }
0x144f   :  { %2236 = vtanh.f32 %v1715_v38 }
0x1455   :  { %v2235_v40 = vpop.eup %2234 }
0x1456   :  { %1620 = vrot.lane.b32.xlu0 %v2235_v40, %s2371_s10  ;;  %v1616_v42 = vmul.f32 0.5, %v2235_v40 }
0x1458   :  { %v1617_v43 = vadd.f32 0.5, %v1616_v42 }
0x1459   :  { %v2237_v41 = vpop.eup %2236 }
0x145a   :  { %1721 = vrot.lane.b32.xlu1 %v2237_v41, %s2371_s10  ;;  %v1717_v18 = vmul.f32 0.5, %v2237_v41  ;;  %v1618_v48 = vmul.f32 %v1617_v43, %v1424_v16 }
0x145c   :  { %v1718_v46 = vadd.f32 0.5, %v1717_v18 }
0x145e   :  { %v1719_v51 = vmul.f32 %v1718_v46, %v1526_v21 }
0x14c8   :  { %v1621_v44 = vpop.permute.xlu0 %1620 }
0x14c9   :  { %v1623_v45 = vmul.f32 %v1621_v44, %v1617_v43 }
0x14cb   :  { %1625 = vrot.lane.b32.xlu0 %v1623_v45, %s2370_s3 }
0x14cc   :  { %v1722_v20 = vpop.permute.xlu1 %1721 }
0x14cd   :  { %v1724_v47 = vmul.f32 %v1722_v20, %v1718_v46 }
0x14cf   :  { %1726 = vrot.lane.b32.xlu1 %v1724_v47, %s2370_s3 }
0x153d   :  { %v1626_v49 = vpop.permute.xlu0 %1625 }
0x153e   :  { %v1628_v50 = vadd.f32 %v1626_v49, %v1618_v48 }
0x1540   :  { %2238 = vtanh.f32 %v1628_v50 }
0x1541   :  { %v1727_v52 = vpop.permute.xlu1 %1726 }
0x1542   :  { %v1729_v53 = vadd.f32 %v1727_v52, %v1719_v51 }
0x1544   :  { %2240 = vtanh.f32 %v1729_v53 }
0x154a   :  { %v2239_v54 = vpop.eup %2238 }
0x154b   :  { %1631 = vrot.lane.b32.xlu0 %v2239_v54, %s2371_s10 }
0x154e   :  { %v2241_v55 = vpop.eup %2240 }
0x154f   :  { %1732 = vrot.lane.b32.xlu1 %v2241_v55, %s2371_s10 }
0x15bd   :  { %v1632_v56 = vpop.permute.xlu0 %1631 }
0x15be   :  { %v1634_v57 = vmul.f32 %v1632_v56, %v1617_v43 }
0x15c0   :  { %1636 = vrot.lane.b32.xlu0 %v1634_v57, %s2370_s3 }
0x15c1   :  { %v1733_v4 = vpop.permute.xlu1 %1732 }
0x15c2   :  { %v1735_v58 = vmul.f32 %v1733_v4, %v1718_v46 }
0x15c4   :  { %1737 = vrot.lane.b32.xlu1 %v1735_v58, %s2370_s3  ;;  %1743 = vrot.lane.b32.xlu0 %v1628_v50, %s2372_s2 }
0x15c8   :  { %1749 = vrot.lane.b32.xlu1 %v1729_v53, %s2372_s2 }
0x1632   :  { %v1637_v59 = vpop.permute.xlu0 %1636 }
0x1633   :  { %1640 = vst.msk [vmem:[#allocation12 + $0x38] sm:$0xff] %vm74_vm0, %v1637_v59  ;;  %1741 = vst.msk [vmem:[#allocation3] sm:$0xff] %vm74_vm0, %v1637_v59 }
0x1634   :  { %2319 = shalt.err (!%p2316_p0)
}
0x1635   :  { %s2320_s17 = scalar_lea.hbm %s2721_s4, 1024 }
0x1636   :  { %p2321_p1 = scmp.ne.s32.totalorder %s2721_s4, %s2320_s17  ;;  %p2324_p2 = scmp.lt.u32.totalorder %s2320_s17, %s2721_s4 }
0x1638   :  { %p2326_p3 = pnand %p2324_p2, %p2321_p1 }
0x163a   :  { %2329 = shalt.err (!%p2326_p3)
}
0x163b   :  { %1764 = dma.vmem_to_hbm [thread:$0]  %s1759_s12, 1024, %s2721_s4, [#allocation9], %s2363_s28, %s2363_s28, %s2364_s29   ;;  %v1738_v60 = vpop.permute.xlu1 %1737  ;;  %v1744_v61 = vpop.permute.xlu0 %1743 }
0x163c   :  { %1740 = vst.msk [vmem:[#allocation13] sm:$0xff] %vm74_vm0, %v1738_v60  ;;  %1747 = vst.msk [vmem:[#allocation5] sm:$0xff] %vm74_vm0, %v1738_v60  ;;  %s2330_s24 = scalar_lea.vmem %s1775_s14, 1024  ;;  %p2335_p5 = scmp.lt.s32.totalorder %s1775_s14, %s1775_s14 }
0x163d   :  { %1746 = vst.msk [vmem:[#allocation4] sm:$0xff] %vm74_vm0, %v1744_v61  ;;  %p2331_p4 = scmp.ne.s32.totalorder %s1775_s14, %s2330_s24  ;;  %p2336_p6 = scmp.lt.s32.totalorder %s2330_s24, %s2330_s24 }
0x163f   :  { %p2337_p7 = por %p2336_p6, %p2335_p5 }
0x1641   :  { %p2338_p8 = pnand %p2337_p7, %p2331_p4 }
0x1643   :  { %2341 = shalt.err (!%p2338_p8)
}
0x1644   :  { %s2342_s4 = scalar_lea.hbm %s2722_s5, 1024 }
0x1645   :  { %p2343_p9 = scmp.ne.s32.totalorder %s2722_s5, %s2342_s4  ;;  %p2346_p10 = scmp.lt.u32.totalorder %s2342_s4, %s2722_s5 }
0x1647   :  { %p2348_p11 = pnand %p2346_p10, %p2343_p9 }
0x1649   :  { %2351 = shalt.err (!%p2348_p11)
}
0x164a   :  { %1780 = dma.vmem_to_hbm [thread:$0]  %s1775_s14, 1024, %s2722_s5, [#allocation14], %s2363_s28, %s2363_s28, %s2364_s29   ;;  %v1750_v62 = vpop.permute.xlu1 %1749 }
0x164b   :  { %1752 = vst.msk [vmem:[#allocation6] sm:$0xff] %vm74_vm0, %v1750_v62 }
0x164c   :  { %2358 = dma.done.wait [#allocation9], 1024  }
0x164d   :  { %2359 = vsyncadd [#allocation9], 4294966272 }
0x164e   :  { %2360 = dma.done.wait [#allocation14], 1024  }
0x164f   :  { %2361 = vsyncadd [#allocation14], 4294966272 }
0x1650   :  { %1787 = vsyncpa [#allocation8], 1 }
0x1651   :  { %1788 = vsyncpa [#allocation11], 1 }
0x1652   :  { %1789 = vsyncpa [#allocation9], 1 }
0x1653   :  { %1790 = vsyncpa [#allocation14], 1 }

</bundles_post_ra>
